<compile_context>
chip_gen: v7x
topology: tpu7x:2x2x1
jax: 0.10.0
libtpu: 0.0.40
codegen_flags: <defaults>
</compile_context>

<pallas_src>
import functools

import jax
import jax.numpy as jnp
from jax import lax
from jax.experimental import pallas as pl
from jax.experimental.pallas import tpu as pltpu

# ---- Constants (stand-in for model/model.py `Constants`) --------------------
DROPOUT = 0.2          # identity at inference (eval mode)
HIDDEN_SIZE1 = 32
HIDDEN_SIZE2 = 32
NUM_LAYERS = 2


def _round_up(n, m):
  return ((n + m - 1) // m) * m


# ----------------------------- Fused Pallas kernel ----------------------------
def _fused_nba_lstm_kernel(x_ref, w_ref, out_ref, *, T, Bp, H, L, din0,
                           off_ih, off_hh, off_b, off_fcw, off_fcb):
  """Fused (NUM_LAYERS+1)-layer LSTM (wavefront schedule) + Linear + sigmoid.

  x_ref : (T*Bp, din0) f32, time-major flattened input.
  w_ref : (R, 4H) f32, packed weights (g-gate columns pre-scaled by 2).
  out_ref: (Bp, 1) f32, sigmoid(fc(h_{last layer, T-1})).
  """
  f32 = jnp.float32
  bf16 = jnp.bfloat16
  G = 4 * H

  # ---- unpack packed weights (static, 8-row-aligned slices) -----------------
  w_hh = [w_ref[pl.ds(off_hh[l], H), :].astype(bf16) for l in range(L)]
  w_ih0 = w_ref[pl.ds(off_ih[0], din0), :]
  w_ih_b = [None] + [w_ref[pl.ds(off_ih[l], H), :].astype(bf16)
                     for l in range(1, L)]
  b0 = w_ref[pl.ds(off_b[0], 1), :]
  # Hoist the sublane broadcast of the per-step biases out of the loop.
  b_full = [None] + [jnp.broadcast_to(w_ref[pl.ds(off_b[l], 1), :], (Bp, G))
                     for l in range(1, L)]

  # ---- layer-0 input projection hoisted over all timesteps (one MXU matmul,
  #      bias folded in); kept as a value (8 vregs at T*Bp=64) -----------------
  x = x_ref[...]                                           # (T*Bp, din0) f32
  gx0 = (jnp.dot(x.astype(bf16), w_ih0.astype(bf16),
                 preferred_element_type=f32) + b0)         # (T*Bp, 4H)

  h = [jnp.zeros((Bp, H), f32) for _ in range(L)]
  c = [jnp.zeros((Bp, H), f32) for _ in range(L)]

  def cell(gates, c_prev):
    # Single full-width EUP pass: g-gate columns were pre-scaled by 2 at pack
    # time, so tanh(x) = 2*sigmoid(2x) - 1 falls out of the same sigmoid.
    sig = jax.nn.sigmoid(gates)
    i = sig[:, 0 * H:1 * H]                                # PyTorch order i,f,g,o
    f = sig[:, 1 * H:2 * H]
    g = 2.0 * sig[:, 2 * H:3 * H] - 1.0
    o = sig[:, 3 * H:4 * H]
    c_new = f * c_prev + i * g
    h_new = o * jnp.tanh(c_new)                            # small (Bp, H) tanh
    return h_new, c_new

  # ---- wavefront schedule: wavefront w processes (layer l, time t = w - l). -
  # Every step of a wavefront depends only on values produced in the previous
  # wavefront, so the per-layer matmuls issue back-to-back and pipeline in the
  # MXU.  Layers are visited high->low so in-place h/c updates always read the
  # previous-wavefront values.
  for w in range(T + L - 1):                               # static unroll
    for l in range(L - 1, -1, -1):
      t = w - l
      if 0 <= t < T:
        if l == 0:
          gates = gx0[t * Bp:(t + 1) * Bp, :] + jnp.dot(
              h[0].astype(bf16), w_hh[0], preferred_element_type=f32)
        else:
          # Layer input h[l-1] is h_{l-1, t} (produced at wavefront w-1).
          gates = (jnp.dot(h[l - 1].astype(bf16), w_ih_b[l],
                           preferred_element_type=f32)
                   + jnp.dot(h[l].astype(bf16), w_hh[l],
                             preferred_element_type=f32)
                   + b_full[l])
        h[l], c[l] = cell(gates, c[l])

  # ---- fc + sigmoid on h_{L-1, T-1} (== out2[:, -1, :]); kept in f32 --------
  fcw = w_ref[pl.ds(off_fcw, H), :][:, 0:1]                # (H, 1)
  fcb = w_ref[pl.ds(off_fcb, 1), :][:, 0:1]                # (1, 1)
  logits = jnp.dot(h[L - 1], fcw, preferred_element_type=f32) + fcb
  out_ref[...] = jax.nn.sigmoid(logits)


# ------------------------------ Packing + wrapper ------------------------------
def pack_params(params):
  """Pack all weights into one (R, 4H) f32 array (blocks padded to 8 rows).

  Also pre-scales the g-gate (cell candidate) columns [2H:3H) of W_ih, W_hh
  and the combined bias by 2, so the kernel can use tanh(x) = 2*sigmoid(2x)-1.
  Done once at prep time, not per call.
  """
  layers = list(params["lstm1"]) + [params["lstm2"]]
  L = len(layers)
  H = layers[-1][1].shape[0]                               # w_hh stored (H, 4H)
  for (_, w_hh, _) in layers:
    assert w_hh.shape[0] == H, "fused kernel assumes hidden_size1 == hidden_size2"
  G = 4 * H
  gscale = jnp.ones((G,), jnp.float32).at[2 * H:3 * H].set(2.0)

  blocks = []
  row = [0]

  def push(a):
    off = row[0]
    r, cdim = a.shape
    rp = _round_up(r, 8)
    blocks.append(jnp.pad(a.astype(jnp.float32), ((0, rp - r), (0, G - cdim))))
    row[0] += rp
    return off

  off_ih, off_hh, off_b = [], [], []
  for (w_ih, w_hh, b) in layers:
    off_ih.append(push(w_ih * gscale[None, :]))
    off_hh.append(push(w_hh * gscale[None, :]))
    off_b.append(push(b * gscale[None, :]))
  off_fcw = push(params["fc_w"])                           # (H, 1) -> lane-padded
  off_fcb = push(params["fc_b"])                           # (1, 1)

  wpack = jnp.concatenate(blocks, axis=0)                  # (R, 4H) f32
  meta = dict(L=L, H=H,
              off_ih=tuple(off_ih), off_hh=tuple(off_hh), off_b=tuple(off_b),
              off_fcw=off_fcw, off_fcb=off_fcb)
  return wpack, meta


def make_forward(meta):
  L, H = meta["L"], meta["H"]

  @jax.jit
  def forward(x, wpack):
    """x: (B, T, input_size), batch-first like PyTorch.  Returns (B, 1)."""
    B, T, Din = x.shape
    Bp = _round_up(B, 8)                                   # pad to sublane multiple

    # Time-major + batch pad + flatten -> (T*Bp, Din): one matmul for the whole
    # layer-0 input projection inside the kernel.
    x_tm = jnp.transpose(x, (1, 0, 2)).astype(jnp.float32)
    if Bp != B:
      x_tm = jnp.pad(x_tm, ((0, 0), (0, Bp - B), (0, 0)))
    x2d = x_tm.reshape(T * Bp, Din)

    # TODO(synk): dropout is a no-op here (inference semantics); training-mode
    #             stochastic dropout not implemented.
    # TODO(synk): before scaling T/B (esp. on v7x with 64 MiB VMEM/TC), tile
    #             the hoisted projection over a time grid axis ("arbitrary"),
    #             set vmem_limit_bytes, and add a batch-parallel grid axis
    #             ("parallel") once B > ~16 rows.

    kernel = functools.partial(
        _fused_nba_lstm_kernel, T=T, Bp=Bp, H=H, L=L, din0=Din,
        off_ih=meta["off_ih"], off_hh=meta["off_hh"], off_b=meta["off_b"],
        off_fcw=meta["off_fcw"], off_fcb=meta["off_fcb"])

    out = pl.pallas_call(
        kernel,
        out_shape=jax.ShapeDtypeStruct((Bp, 1), jnp.float32),
        in_specs=[pl.BlockSpec(memory_space=pltpu.MemorySpace.VMEM)] * 2,
        out_specs=pl.BlockSpec(memory_space=pltpu.MemorySpace.VMEM),
    )(x2d, wpack)
    return out[:B]

  return forward


# --------------------------- Parameter init -----------------------------------
def _init_lstm_weights(key, in_dim, hidden):
  """PyTorch-style uniform(-1/sqrt(H), 1/sqrt(H)); returns (W_ih, W_hh, b)."""
  k = 1.0 / jnp.sqrt(hidden)
  k1, k2, k3, k4 = jax.random.split(key, 4)
  w_ih = jax.random.uniform(k1, (4 * hidden, in_dim), jnp.float32, -k, k)
  w_hh = jax.random.uniform(k2, (4 * hidden, hidden), jnp.float32, -k, k)
  b_ih = jax.random.uniform(k3, (4 * hidden,), jnp.float32, -k, k)
  b_hh = jax.random.uniform(k4, (4 * hidden,), jnp.float32, -k, k)
  # Kernel/reference expect (Din,4H)/(H,4H) and combined bias as (1,4H).
  return w_ih.T, w_hh.T, (b_ih + b_hh)[None, :]


def init_params(key, input_size, h1=HIDDEN_SIZE1, h2=HIDDEN_SIZE2,
                num_layers=NUM_LAYERS):
  keys = jax.random.split(key, num_layers + 2)
  lstm1 = []
  in_dim = input_size
  for layer in range(num_layers):
    lstm1.append(_init_lstm_weights(keys[layer], in_dim, h1))
    in_dim = h1
  lstm2 = _init_lstm_weights(keys[num_layers], h1, h2)
  kfc = 1.0 / jnp.sqrt(h2)
  kw, kb = jax.random.split(keys[num_layers + 1])
  fc_w = jax.random.uniform(kw, (h2, 1), jnp.float32, -kfc, kfc)
  fc_b = jax.random.uniform(kb, (1, 1), jnp.float32, -kfc, kfc)
  return {"lstm1": lstm1, "lstm2": lstm2, "fc_w": fc_w, "fc_b": fc_b}


# ----------------------- Pure-JAX reference (self-check) ----------------------
def _ref_lstm_layer(x_tm, w_ih, w_hh, b):
  T, B, _ = x_tm.shape
  H = w_hh.shape[0]

  def step(carry, x_t):
    h, c = carry
    gates = x_t @ w_ih + h @ w_hh + b
    i = jax.nn.sigmoid(gates[:, :H])
    f = jax.nn.sigmoid(gates[:, H:2 * H])
    g = jnp.tanh(gates[:, 2 * H:3 * H])
    o = jax.nn.sigmoid(gates[:, 3 * H:])
    c = f * c + i * g
    h = o * jnp.tanh(c)
    return (h, c), h

  init = (jnp.zeros((B, H), jnp.float32), jnp.zeros((B, H), jnp.float32))
  _, ys = lax.scan(step, init, x_tm)
  return ys


def _ref_forward(x, params):
  h = jnp.transpose(x, (1, 0, 2)).astype(jnp.float32)
  for (w_ih, w_hh, b) in params["lstm1"]:
    h = _ref_lstm_layer(h, w_ih, w_hh, b)
  w_ih2, w_hh2, b2 = params["lstm2"]
  h = _ref_lstm_layer(h, w_ih2, w_hh2, b2)
  return jax.nn.sigmoid(h[-1] @ params["fc_w"] + params["fc_b"])


# ----------------------------------- Main --------------------------------------
if __name__ == "__main__":
  B, T, INPUT_SIZE = 4, 8, 16   # small shapes consistent with the module
  key = jax.random.PRNGKey(0)
  kx, kp = jax.random.split(key)
  x = jax.random.normal(kx, (B, T, INPUT_SIZE), jnp.float32)
  params = init_params(kp, INPUT_SIZE)

  wpack, meta = pack_params(params)
  forward = make_forward(meta)

  out = forward(x, wpack)
  out = jax.block_until_ready(out)
  assert out.shape == (B, 1), out.shape

  ref = _ref_forward(x, params)
  # Tolerance loosened vs. exact-f32 parity: MXU operands are bf16 (f32 acc).
  assert jnp.allclose(out, ref, atol=2e-2, rtol=2e-2), (out, ref)

  print("KERNEL_OK")
</pallas_src>

<mosaic_0001>
module attributes {stable_mosaic.version = 11 : i64} {
  func.func @_fused_nba_lstm_kernel(%arg0: memref<64x16xf32, #tpu.memory_space<vmem>>, %arg1: memref<240x128xf32, #tpu.memory_space<vmem>>, %arg2: memref<8x1xf32, #tpu.memory_space<vmem>>) attributes {dimension_semantics = [], scalar_prefetch = 0 : i64, scratch_operands = 0 : i64, tpu.core_type = #tpu.core_type<tc>} {
    %c16 = arith.constant 16 : index
    %c0 = arith.constant 0 : index
    %0 = vector.load %arg1[%c16, %c0] : memref<240x128xf32, #tpu.memory_space<vmem>>, vector<32x128xf32>
    %1 = arith.truncf %0 : vector<32x128xf32> to vector<32x128xbf16>
    %c88 = arith.constant 88 : index
    %c0_0 = arith.constant 0 : index
    %2 = vector.load %arg1[%c88, %c0_0] : memref<240x128xf32, #tpu.memory_space<vmem>>, vector<32x128xf32>
    %3 = arith.truncf %2 : vector<32x128xf32> to vector<32x128xbf16>
    %c160 = arith.constant 160 : index
    %c0_1 = arith.constant 0 : index
    %4 = vector.load %arg1[%c160, %c0_1] : memref<240x128xf32, #tpu.memory_space<vmem>>, vector<32x128xf32>
    %5 = arith.truncf %4 : vector<32x128xf32> to vector<32x128xbf16>
    %c0_2 = arith.constant 0 : index
    %c0_3 = arith.constant 0 : index
    %6 = vector.load %arg1[%c0_2, %c0_3] : memref<240x128xf32, #tpu.memory_space<vmem>>, vector<16x128xf32>
    %c56 = arith.constant 56 : index
    %c0_4 = arith.constant 0 : index
    %7 = vector.load %arg1[%c56, %c0_4] : memref<240x128xf32, #tpu.memory_space<vmem>>, vector<32x128xf32>
    %8 = arith.truncf %7 : vector<32x128xf32> to vector<32x128xbf16>
    %c128 = arith.constant 128 : index
    %c0_5 = arith.constant 0 : index
    %9 = vector.load %arg1[%c128, %c0_5] : memref<240x128xf32, #tpu.memory_space<vmem>>, vector<32x128xf32>
    %10 = arith.truncf %9 : vector<32x128xf32> to vector<32x128xbf16>
    %c48 = arith.constant 48 : index
    %c0_6 = arith.constant 0 : index
    %11 = vector.load %arg1[%c48, %c0_6] : memref<240x128xf32, #tpu.memory_space<vmem>>, vector<1x128xf32>
    %c120 = arith.constant 120 : index
    %c0_7 = arith.constant 0 : index
    %12 = vector.load %arg1[%c120, %c0_7] : memref<240x128xf32, #tpu.memory_space<vmem>>, vector<1x128xf32>
    %13 = vector.shape_cast %12 : vector<1x128xf32> to vector<1x128xf32>
    %14 = vector.broadcast %13 : vector<1x128xf32> to vector<8x128xf32>
    %c192 = arith.constant 192 : index
    %c0_8 = arith.constant 0 : index
    %15 = vector.load %arg1[%c192, %c0_8] : memref<240x128xf32, #tpu.memory_space<vmem>>, vector<1x128xf32>
    %16 = vector.shape_cast %15 : vector<1x128xf32> to vector<1x128xf32>
    %17 = vector.broadcast %16 : vector<1x128xf32> to vector<8x128xf32>
    %c0_9 = arith.constant 0 : index
    %c0_10 = arith.constant 0 : index
    %18 = vector.load %arg0[%c0_9, %c0_10] : memref<64x16xf32, #tpu.memory_space<vmem>>, vector<64x16xf32>
    %19 = arith.truncf %18 : vector<64x16xf32> to vector<64x16xbf16>
    %20 = arith.truncf %6 : vector<16x128xf32> to vector<16x128xbf16>
    %cst = arith.constant dense<0.000000e+00> : vector<64x128xf32>
    %21 = tpu.matmul %19, %20, %cst {dimension_numbers = #tpu.dot_dimension_numbers<[1], [0], [0], [1], [0, 0, 1, 1], [], []>} : vector<64x16xbf16>, vector<16x128xbf16>, vector<64x128xf32> -> vector<64x128xf32>
    %22 = vector.broadcast %11 : vector<1x128xf32> to vector<64x128xf32>
    %23 = arith.addf %21, %22 : vector<64x128xf32>
    %cst_11 = arith.constant 0.000000e+00 : f32
    %24 = vector.broadcast %cst_11 : f32 to vector<8x32xf32>
    %cst_12 = arith.constant 0.000000e+00 : f32
    %25 = vector.broadcast %cst_12 : f32 to vector<8x32xf32>
    %cst_13 = arith.constant 0.000000e+00 : f32
    %26 = vector.broadcast %cst_13 : f32 to vector<8x32xf32>
    %cst_14 = arith.constant 0.000000e+00 : f32
    %27 = vector.broadcast %cst_14 : f32 to vector<8x32xf32>
    %cst_15 = arith.constant 0.000000e+00 : f32
    %28 = vector.broadcast %cst_15 : f32 to vector<8x32xf32>
    %cst_16 = arith.constant 0.000000e+00 : f32
    %29 = vector.broadcast %cst_16 : f32 to vector<8x32xf32>
    %30 = vector.extract_strided_slice %23 {offsets = [0, 0], sizes = [8, 128], strides = [1, 1]} : vector<64x128xf32> to vector<8x128xf32>
    %31 = arith.truncf %24 : vector<8x32xf32> to vector<8x32xbf16>
    %cst_17 = arith.constant dense<0.000000e+00> : vector<8x128xf32>
    %32 = tpu.matmul %31, %1, %cst_17 {dimension_numbers = #tpu.dot_dimension_numbers<[1], [0], [0], [1], [0, 0, 1, 1], [], []>} : vector<8x32xbf16>, vector<32x128xbf16>, vector<8x128xf32> -> vector<8x128xf32>
    %33 = arith.addf %30, %32 : vector<8x128xf32>
    %34 = arith.negf %33 : vector<8x128xf32>
    %35 = math.exp %34 : vector<8x128xf32>
    %cst_18 = arith.constant 1.000000e+00 : f32
    %36 = vector.broadcast %cst_18 : f32 to vector<8x128xf32>
    %37 = arith.addf %36, %35 : vector<8x128xf32>
    %38 = arith.divf %36, %37 : vector<8x128xf32>
    %39 = vector.extract_strided_slice %38 {offsets = [0, 0], sizes = [8, 32], strides = [1, 1]} : vector<8x128xf32> to vector<8x32xf32>
    %40 = vector.extract_strided_slice %38 {offsets = [0, 32], sizes = [8, 32], strides = [1, 1]} : vector<8x128xf32> to vector<8x32xf32>
    %41 = vector.extract_strided_slice %38 {offsets = [0, 64], sizes = [8, 32], strides = [1, 1]} : vector<8x128xf32> to vector<8x32xf32>
    %cst_19 = arith.constant 2.000000e+00 : f32
    %42 = vector.broadcast %cst_19 : f32 to vector<8x32xf32>
    %43 = arith.mulf %42, %41 : vector<8x32xf32>
    %cst_20 = arith.constant 1.000000e+00 : f32
    %44 = vector.broadcast %cst_20 : f32 to vector<8x32xf32>
    %45 = arith.subf %43, %44 : vector<8x32xf32>
    %46 = vector.extract_strided_slice %38 {offsets = [0, 96], sizes = [8, 32], strides = [1, 1]} : vector<8x128xf32> to vector<8x32xf32>
    %47 = arith.mulf %40, %27 : vector<8x32xf32>
    %48 = arith.mulf %39, %45 : vector<8x32xf32>
    %49 = arith.addf %47, %48 : vector<8x32xf32>
    %50 = math.tanh %49 : vector<8x32xf32>
    %51 = arith.mulf %46, %50 : vector<8x32xf32>
    %52 = arith.truncf %51 : vector<8x32xf32> to vector<8x32xbf16>
    %cst_21 = arith.constant dense<0.000000e+00> : vector<8x128xf32>
    %53 = tpu.matmul %52, %8, %cst_21 {dimension_numbers = #tpu.dot_dimension_numbers<[1], [0], [0], [1], [0, 0, 1, 1], [], []>} : vector<8x32xbf16>, vector<32x128xbf16>, vector<8x128xf32> -> vector<8x128xf32>
    %54 = arith.truncf %25 : vector<8x32xf32> to vector<8x32xbf16>
    %cst_22 = arith.constant dense<0.000000e+00> : vector<8x128xf32>
    %55 = tpu.matmul %54, %3, %cst_22 {dimension_numbers = #tpu.dot_dimension_numbers<[1], [0], [0], [1], [0, 0, 1, 1], [], []>} : vector<8x32xbf16>, vector<32x128xbf16>, vector<8x128xf32> -> vector<8x128xf32>
    %56 = arith.addf %53, %55 : vector<8x128xf32>
    %57 = arith.addf %56, %14 : vector<8x128xf32>
    %58 = arith.negf %57 : vector<8x128xf32>
    %59 = math.exp %58 : vector<8x128xf32>
    %cst_23 = arith.constant 1.000000e+00 : f32
    %60 = vector.broadcast %cst_23 : f32 to vector<8x128xf32>
    %61 = arith.addf %60, %59 : vector<8x128xf32>
    %62 = arith.divf %60, %61 : vector<8x128xf32>
    %63 = vector.extract_strided_slice %62 {offsets = [0, 0], sizes = [8, 32], strides = [1, 1]} : vector<8x128xf32> to vector<8x32xf32>
    %64 = vector.extract_strided_slice %62 {offsets = [0, 32], sizes = [8, 32], strides = [1, 1]} : vector<8x128xf32> to vector<8x32xf32>
    %65 = vector.extract_strided_slice %62 {offsets = [0, 64], sizes = [8, 32], strides = [1, 1]} : vector<8x128xf32> to vector<8x32xf32>
    %cst_24 = arith.constant 2.000000e+00 : f32
    %66 = vector.broadcast %cst_24 : f32 to vector<8x32xf32>
    %67 = arith.mulf %66, %65 : vector<8x32xf32>
    %cst_25 = arith.constant 1.000000e+00 : f32
    %68 = vector.broadcast %cst_25 : f32 to vector<8x32xf32>
    %69 = arith.subf %67, %68 : vector<8x32xf32>
    %70 = vector.extract_strided_slice %62 {offsets = [0, 96], sizes = [8, 32], strides = [1, 1]} : vector<8x128xf32> to vector<8x32xf32>
    %71 = arith.mulf %64, %28 : vector<8x32xf32>
    %72 = arith.mulf %63, %69 : vector<8x32xf32>
    %73 = arith.addf %71, %72 : vector<8x32xf32>
    %74 = math.tanh %73 : vector<8x32xf32>
    %75 = arith.mulf %70, %74 : vector<8x32xf32>
    %76 = vector.extract_strided_slice %23 {offsets = [8, 0], sizes = [8, 128], strides = [1, 1]} : vector<64x128xf32> to vector<8x128xf32>
    %77 = arith.truncf %51 : vector<8x32xf32> to vector<8x32xbf16>
    %cst_26 = arith.constant dense<0.000000e+00> : vector<8x128xf32>
    %78 = tpu.matmul %77, %1, %cst_26 {dimension_numbers = #tpu.dot_dimension_numbers<[1], [0], [0], [1], [0, 0, 1, 1], [], []>} : vector<8x32xbf16>, vector<32x128xbf16>, vector<8x128xf32> -> vector<8x128xf32>
    %79 = arith.addf %76, %78 : vector<8x128xf32>
    %80 = arith.negf %79 : vector<8x128xf32>
    %81 = math.exp %80 : vector<8x128xf32>
    %cst_27 = arith.constant 1.000000e+00 : f32
    %82 = vector.broadcast %cst_27 : f32 to vector<8x128xf32>
    %83 = arith.addf %82, %81 : vector<8x128xf32>
    %84 = arith.divf %82, %83 : vector<8x128xf32>
    %85 = vector.extract_strided_slice %84 {offsets = [0, 0], sizes = [8, 32], strides = [1, 1]} : vector<8x128xf32> to vector<8x32xf32>
    %86 = vector.extract_strided_slice %84 {offsets = [0, 32], sizes = [8, 32], strides = [1, 1]} : vector<8x128xf32> to vector<8x32xf32>
    %87 = vector.extract_strided_slice %84 {offsets = [0, 64], sizes = [8, 32], strides = [1, 1]} : vector<8x128xf32> to vector<8x32xf32>
    %cst_28 = arith.constant 2.000000e+00 : f32
    %88 = vector.broadcast %cst_28 : f32 to vector<8x32xf32>
    %89 = arith.mulf %88, %87 : vector<8x32xf32>
    %cst_29 = arith.constant 1.000000e+00 : f32
    %90 = vector.broadcast %cst_29 : f32 to vector<8x32xf32>
    %91 = arith.subf %89, %90 : vector<8x32xf32>
    %92 = vector.extract_strided_slice %84 {offsets = [0, 96], sizes = [8, 32], strides = [1, 1]} : vector<8x128xf32> to vector<8x32xf32>
    %93 = arith.mulf %86, %49 : vector<8x32xf32>
    %94 = arith.mulf %85, %91 : vector<8x32xf32>
    %95 = arith.addf %93, %94 : vector<8x32xf32>
    %96 = math.tanh %95 : vector<8x32xf32>
    %97 = arith.mulf %92, %96 : vector<8x32xf32>
    %98 = arith.truncf %75 : vector<8x32xf32> to vector<8x32xbf16>
    %cst_30 = arith.constant dense<0.000000e+00> : vector<8x128xf32>
    %99 = tpu.matmul %98, %10, %cst_30 {dimension_numbers = #tpu.dot_dimension_numbers<[1], [0], [0], [1], [0, 0, 1, 1], [], []>} : vector<8x32xbf16>, vector<32x128xbf16>, vector<8x128xf32> -> vector<8x128xf32>
    %100 = arith.truncf %26 : vector<8x32xf32> to vector<8x32xbf16>
    %cst_31 = arith.constant dense<0.000000e+00> : vector<8x128xf32>
    %101 = tpu.matmul %100, %5, %cst_31 {dimension_numbers = #tpu.dot_dimension_numbers<[1], [0], [0], [1], [0, 0, 1, 1], [], []>} : vector<8x32xbf16>, vector<32x128xbf16>, vector<8x128xf32> -> vector<8x128xf32>
    %102 = arith.addf %99, %101 : vector<8x128xf32>
    %103 = arith.addf %102, %17 : vector<8x128xf32>
    %104 = arith.negf %103 : vector<8x128xf32>
    %105 = math.exp %104 : vector<8x128xf32>
    %cst_32 = arith.constant 1.000000e+00 : f32
    %106 = vector.broadcast %cst_32 : f32 to vector<8x128xf32>
    %107 = arith.addf %106, %105 : vector<8x128xf32>
    %108 = arith.divf %106, %107 : vector<8x128xf32>
    %109 = vector.extract_strided_slice %108 {offsets = [0, 0], sizes = [8, 32], strides = [1, 1]} : vector<8x128xf32> to vector<8x32xf32>
    %110 = vector.extract_strided_slice %108 {offsets = [0, 32], sizes = [8, 32], strides = [1, 1]} : vector<8x128xf32> to vector<8x32xf32>
    %111 = vector.extract_strided_slice %108 {offsets = [0, 64], sizes = [8, 32], strides = [1, 1]} : vector<8x128xf32> to vector<8x32xf32>
    %cst_33 = arith.constant 2.000000e+00 : f32
    %112 = vector.broadcast %cst_33 : f32 to vector<8x32xf32>
    %113 = arith.mulf %112, %111 : vector<8x32xf32>
    %cst_34 = arith.constant 1.000000e+00 : f32
    %114 = vector.broadcast %cst_34 : f32 to vector<8x32xf32>
    %115 = arith.subf %113, %114 : vector<8x32xf32>
    %116 = vector.extract_strided_slice %108 {offsets = [0, 96], sizes = [8, 32], strides = [1, 1]} : vector<8x128xf32> to vector<8x32xf32>
    %117 = arith.mulf %110, %29 : vector<8x32xf32>
    %118 = arith.mulf %109, %115 : vector<8x32xf32>
    %119 = arith.addf %117, %118 : vector<8x32xf32>
    %120 = math.tanh %119 : vector<8x32xf32>
    %121 = arith.mulf %116, %120 : vector<8x32xf32>
    %122 = arith.truncf %97 : vector<8x32xf32> to vector<8x32xbf16>
    %cst_35 = arith.constant dense<0.000000e+00> : vector<8x128xf32>
    %123 = tpu.matmul %122, %8, %cst_35 {dimension_numbers = #tpu.dot_dimension_numbers<[1], [0], [0], [1], [0, 0, 1, 1], [], []>} : vector<8x32xbf16>, vector<32x128xbf16>, vector<8x128xf32> -> vector<8x128xf32>
    %124 = arith.truncf %75 : vector<8x32xf32> to vector<8x32xbf16>
    %cst_36 = arith.constant dense<0.000000e+00> : vector<8x128xf32>
    %125 = tpu.matmul %124, %3, %cst_36 {dimension_numbers = #tpu.dot_dimension_numbers<[1], [0], [0], [1], [0, 0, 1, 1], [], []>} : vector<8x32xbf16>, vector<32x128xbf16>, vector<8x128xf32> -> vector<8x128xf32>
    %126 = arith.addf %123, %125 : vector<8x128xf32>
    %127 = arith.addf %126, %14 : vector<8x128xf32>
    %128 = arith.negf %127 : vector<8x128xf32>
    %129 = math.exp %128 : vector<8x128xf32>
    %cst_37 = arith.constant 1.000000e+00 : f32
    %130 = vector.broadcast %cst_37 : f32 to vector<8x128xf32>
    %131 = arith.addf %130, %129 : vector<8x128xf32>
    %132 = arith.divf %130, %131 : vector<8x128xf32>
    %133 = vector.extract_strided_slice %132 {offsets = [0, 0], sizes = [8, 32], strides = [1, 1]} : vector<8x128xf32> to vector<8x32xf32>
    %134 = vector.extract_strided_slice %132 {offsets = [0, 32], sizes = [8, 32], strides = [1, 1]} : vector<8x128xf32> to vector<8x32xf32>
    %135 = vector.extract_strided_slice %132 {offsets = [0, 64], sizes = [8, 32], strides = [1, 1]} : vector<8x128xf32> to vector<8x32xf32>
    %cst_38 = arith.constant 2.000000e+00 : f32
    %136 = vector.broadcast %cst_38 : f32 to vector<8x32xf32>
    %137 = arith.mulf %136, %135 : vector<8x32xf32>
    %cst_39 = arith.constant 1.000000e+00 : f32
    %138 = vector.broadcast %cst_39 : f32 to vector<8x32xf32>
    %139 = arith.subf %137, %138 : vector<8x32xf32>
    %140 = vector.extract_strided_slice %132 {offsets = [0, 96], sizes = [8, 32], strides = [1, 1]} : vector<8x128xf32> to vector<8x32xf32>
    %141 = arith.mulf %134, %73 : vector<8x32xf32>
    %142 = arith.mulf %133, %139 : vector<8x32xf32>
    %143 = arith.addf %141, %142 : vector<8x32xf32>
    %144 = math.tanh %143 : vector<8x32xf32>
    %145 = arith.mulf %140, %144 : vector<8x32xf32>
    %146 = vector.extract_strided_slice %23 {offsets = [16, 0], sizes = [8, 128], strides = [1, 1]} : vector<64x128xf32> to vector<8x128xf32>
    %147 = arith.truncf %97 : vector<8x32xf32> to vector<8x32xbf16>
    %cst_40 = arith.constant dense<0.000000e+00> : vector<8x128xf32>
    %148 = tpu.matmul %147, %1, %cst_40 {dimension_numbers = #tpu.dot_dimension_numbers<[1], [0], [0], [1], [0, 0, 1, 1], [], []>} : vector<8x32xbf16>, vector<32x128xbf16>, vector<8x128xf32> -> vector<8x128xf32>
    %149 = arith.addf %146, %148 : vector<8x128xf32>
    %150 = arith.negf %149 : vector<8x128xf32>
    %151 = math.exp %150 : vector<8x128xf32>
    %cst_41 = arith.constant 1.000000e+00 : f32
    %152 = vector.broadcast %cst_41 : f32 to vector<8x128xf32>
    %153 = arith.addf %152, %151 : vector<8x128xf32>
    %154 = arith.divf %152, %153 : vector<8x128xf32>
    %155 = vector.extract_strided_slice %154 {offsets = [0, 0], sizes = [8, 32], strides = [1, 1]} : vector<8x128xf32> to vector<8x32xf32>
    %156 = vector.extract_strided_slice %154 {offsets = [0, 32], sizes = [8, 32], strides = [1, 1]} : vector<8x128xf32> to vector<8x32xf32>
    %157 = vector.extract_strided_slice %154 {offsets = [0, 64], sizes = [8, 32], strides = [1, 1]} : vector<8x128xf32> to vector<8x32xf32>
    %cst_42 = arith.constant 2.000000e+00 : f32
    %158 = vector.broadcast %cst_42 : f32 to vector<8x32xf32>
    %159 = arith.mulf %158, %157 : vector<8x32xf32>
    %cst_43 = arith.constant 1.000000e+00 : f32
    %160 = vector.broadcast %cst_43 : f32 to vector<8x32xf32>
    %161 = arith.subf %159, %160 : vector<8x32xf32>
    %162 = vector.extract_strided_slice %154 {offsets = [0, 96], sizes = [8, 32], strides = [1, 1]} : vector<8x128xf32> to vector<8x32xf32>
    %163 = arith.mulf %156, %95 : vector<8x32xf32>
    %164 = arith.mulf %155, %161 : vector<8x32xf32>
    %165 = arith.addf %163, %164 : vector<8x32xf32>
    %166 = math.tanh %165 : vector<8x32xf32>
    %167 = arith.mulf %162, %166 : vector<8x32xf32>
    %168 = arith.truncf %145 : vector<8x32xf32> to vector<8x32xbf16>
    %cst_44 = arith.constant dense<0.000000e+00> : vector<8x128xf32>
    %169 = tpu.matmul %168, %10, %cst_44 {dimension_numbers = #tpu.dot_dimension_numbers<[1], [0], [0], [1], [0, 0, 1, 1], [], []>} : vector<8x32xbf16>, vector<32x128xbf16>, vector<8x128xf32> -> vector<8x128xf32>
    %170 = arith.truncf %121 : vector<8x32xf32> to vector<8x32xbf16>
    %cst_45 = arith.constant dense<0.000000e+00> : vector<8x128xf32>
    %171 = tpu.matmul %170, %5, %cst_45 {dimension_numbers = #tpu.dot_dimension_numbers<[1], [0], [0], [1], [0, 0, 1, 1], [], []>} : vector<8x32xbf16>, vector<32x128xbf16>, vector<8x128xf32> -> vector<8x128xf32>
    %172 = arith.addf %169, %171 : vector<8x128xf32>
    %173 = arith.addf %172, %17 : vector<8x128xf32>
    %174 = arith.negf %173 : vector<8x128xf32>
    %175 = math.exp %174 : vector<8x128xf32>
    %cst_46 = arith.constant 1.000000e+00 : f32
    %176 = vector.broadcast %cst_46 : f32 to vector<8x128xf32>
    %177 = arith.addf %176, %175 : vector<8x128xf32>
    %178 = arith.divf %176, %177 : vector<8x128xf32>
    %179 = vector.extract_strided_slice %178 {offsets = [0, 0], sizes = [8, 32], strides = [1, 1]} : vector<8x128xf32> to vector<8x32xf32>
    %180 = vector.extract_strided_slice %178 {offsets = [0, 32], sizes = [8, 32], strides = [1, 1]} : vector<8x128xf32> to vector<8x32xf32>
    %181 = vector.extract_strided_slice %178 {offsets = [0, 64], sizes = [8, 32], strides = [1, 1]} : vector<8x128xf32> to vector<8x32xf32>
    %cst_47 = arith.constant 2.000000e+00 : f32
    %182 = vector.broadcast %cst_47 : f32 to vector<8x32xf32>
    %183 = arith.mulf %182, %181 : vector<8x32xf32>
    %cst_48 = arith.constant 1.000000e+00 : f32
    %184 = vector.broadcast %cst_48 : f32 to vector<8x32xf32>
    %185 = arith.subf %183, %184 : vector<8x32xf32>
    %186 = vector.extract_strided_slice %178 {offsets = [0, 96], sizes = [8, 32], strides = [1, 1]} : vector<8x128xf32> to vector<8x32xf32>
    %187 = arith.mulf %180, %119 : vector<8x32xf32>
    %188 = arith.mulf %179, %185 : vector<8x32xf32>
    %189 = arith.addf %187, %188 : vector<8x32xf32>
    %190 = math.tanh %189 : vector<8x32xf32>
    %191 = arith.mulf %186, %190 : vector<8x32xf32>
    %192 = arith.truncf %167 : vector<8x32xf32> to vector<8x32xbf16>
    %cst_49 = arith.constant dense<0.000000e+00> : vector<8x128xf32>
    %193 = tpu.matmul %192, %8, %cst_49 {dimension_numbers = #tpu.dot_dimension_numbers<[1], [0], [0], [1], [0, 0, 1, 1], [], []>} : vector<8x32xbf16>, vector<32x128xbf16>, vector<8x128xf32> -> vector<8x128xf32>
    %194 = arith.truncf %145 : vector<8x32xf32> to vector<8x32xbf16>
    %cst_50 = arith.constant dense<0.000000e+00> : vector<8x128xf32>
    %195 = tpu.matmul %194, %3, %cst_50 {dimension_numbers = #tpu.dot_dimension_numbers<[1], [0], [0], [1], [0, 0, 1, 1], [], []>} : vector<8x32xbf16>, vector<32x128xbf16>, vector<8x128xf32> -> vector<8x128xf32>
    %196 = arith.addf %193, %195 : vector<8x128xf32>
    %197 = arith.addf %196, %14 : vector<8x128xf32>
    %198 = arith.negf %197 : vector<8x128xf32>
    %199 = math.exp %198 : vector<8x128xf32>
    %cst_51 = arith.constant 1.000000e+00 : f32
    %200 = vector.broadcast %cst_51 : f32 to vector<8x128xf32>
    %201 = arith.addf %200, %199 : vector<8x128xf32>
    %202 = arith.divf %200, %201 : vector<8x128xf32>
    %203 = vector.extract_strided_slice %202 {offsets = [0, 0], sizes = [8, 32], strides = [1, 1]} : vector<8x128xf32> to vector<8x32xf32>
    %204 = vector.extract_strided_slice %202 {offsets = [0, 32], sizes = [8, 32], strides = [1, 1]} : vector<8x128xf32> to vector<8x32xf32>
    %205 = vector.extract_strided_slice %202 {offsets = [0, 64], sizes = [8, 32], strides = [1, 1]} : vector<8x128xf32> to vector<8x32xf32>
    %cst_52 = arith.constant 2.000000e+00 : f32
    %206 = vector.broadcast %cst_52 : f32 to vector<8x32xf32>
    %207 = arith.mulf %206, %205 : vector<8x32xf32>
    %cst_53 = arith.constant 1.000000e+00 : f32
    %208 = vector.broadcast %cst_53 : f32 to vector<8x32xf32>
    %209 = arith.subf %207, %208 : vector<8x32xf32>
    %210 = vector.extract_strided_slice %202 {offsets = [0, 96], sizes = [8, 32], strides = [1, 1]} : vector<8x128xf32> to vector<8x32xf32>
    %211 = arith.mulf %204, %143 : vector<8x32xf32>
    %212 = arith.mulf %203, %209 : vector<8x32xf32>
    %213 = arith.addf %211, %212 : vector<8x32xf32>
    %214 = math.tanh %213 : vector<8x32xf32>
    %215 = arith.mulf %210, %214 : vector<8x32xf32>
    %216 = vector.extract_strided_slice %23 {offsets = [24, 0], sizes = [8, 128], strides = [1, 1]} : vector<64x128xf32> to vector<8x128xf32>
    %217 = arith.truncf %167 : vector<8x32xf32> to vector<8x32xbf16>
    %cst_54 = arith.constant dense<0.000000e+00> : vector<8x128xf32>
    %218 = tpu.matmul %217, %1, %cst_54 {dimension_numbers = #tpu.dot_dimension_numbers<[1], [0], [0], [1], [0, 0, 1, 1], [], []>} : vector<8x32xbf16>, vector<32x128xbf16>, vector<8x128xf32> -> vector<8x128xf32>
    %219 = arith.addf %216, %218 : vector<8x128xf32>
    %220 = arith.negf %219 : vector<8x128xf32>
    %221 = math.exp %220 : vector<8x128xf32>
    %cst_55 = arith.constant 1.000000e+00 : f32
    %222 = vector.broadcast %cst_55 : f32 to vector<8x128xf32>
    %223 = arith.addf %222, %221 : vector<8x128xf32>
    %224 = arith.divf %222, %223 : vector<8x128xf32>
    %225 = vector.extract_strided_slice %224 {offsets = [0, 0], sizes = [8, 32], strides = [1, 1]} : vector<8x128xf32> to vector<8x32xf32>
    %226 = vector.extract_strided_slice %224 {offsets = [0, 32], sizes = [8, 32], strides = [1, 1]} : vector<8x128xf32> to vector<8x32xf32>
    %227 = vector.extract_strided_slice %224 {offsets = [0, 64], sizes = [8, 32], strides = [1, 1]} : vector<8x128xf32> to vector<8x32xf32>
    %cst_56 = arith.constant 2.000000e+00 : f32
    %228 = vector.broadcast %cst_56 : f32 to vector<8x32xf32>
    %229 = arith.mulf %228, %227 : vector<8x32xf32>
    %cst_57 = arith.constant 1.000000e+00 : f32
    %230 = vector.broadcast %cst_57 : f32 to vector<8x32xf32>
    %231 = arith.subf %229, %230 : vector<8x32xf32>
    %232 = vector.extract_strided_slice %224 {offsets = [0, 96], sizes = [8, 32], strides = [1, 1]} : vector<8x128xf32> to vector<8x32xf32>
    %233 = arith.mulf %226, %165 : vector<8x32xf32>
    %234 = arith.mulf %225, %231 : vector<8x32xf32>
    %235 = arith.addf %233, %234 : vector<8x32xf32>
    %236 = math.tanh %235 : vector<8x32xf32>
    %237 = arith.mulf %232, %236 : vector<8x32xf32>
    %238 = arith.truncf %215 : vector<8x32xf32> to vector<8x32xbf16>
    %cst_58 = arith.constant dense<0.000000e+00> : vector<8x128xf32>
    %239 = tpu.matmul %238, %10, %cst_58 {dimension_numbers = #tpu.dot_dimension_numbers<[1], [0], [0], [1], [0, 0, 1, 1], [], []>} : vector<8x32xbf16>, vector<32x128xbf16>, vector<8x128xf32> -> vector<8x128xf32>
    %240 = arith.truncf %191 : vector<8x32xf32> to vector<8x32xbf16>
    %cst_59 = arith.constant dense<0.000000e+00> : vector<8x128xf32>
    %241 = tpu.matmul %240, %5, %cst_59 {dimension_numbers = #tpu.dot_dimension_numbers<[1], [0], [0], [1], [0, 0, 1, 1], [], []>} : vector<8x32xbf16>, vector<32x128xbf16>, vector<8x128xf32> -> vector<8x128xf32>
    %242 = arith.addf %239, %241 : vector<8x128xf32>
    %243 = arith.addf %242, %17 : vector<8x128xf32>
    %244 = arith.negf %243 : vector<8x128xf32>
    %245 = math.exp %244 : vector<8x128xf32>
    %cst_60 = arith.constant 1.000000e+00 : f32
    %246 = vector.broadcast %cst_60 : f32 to vector<8x128xf32>
    %247 = arith.addf %246, %245 : vector<8x128xf32>
    %248 = arith.divf %246, %247 : vector<8x128xf32>
    %249 = vector.extract_strided_slice %248 {offsets = [0, 0], sizes = [8, 32], strides = [1, 1]} : vector<8x128xf32> to vector<8x32xf32>
    %250 = vector.extract_strided_slice %248 {offsets = [0, 32], sizes = [8, 32], strides = [1, 1]} : vector<8x128xf32> to vector<8x32xf32>
    %251 = vector.extract_strided_slice %248 {offsets = [0, 64], sizes = [8, 32], strides = [1, 1]} : vector<8x128xf32> to vector<8x32xf32>
    %cst_61 = arith.constant 2.000000e+00 : f32
    %252 = vector.broadcast %cst_61 : f32 to vector<8x32xf32>
    %253 = arith.mulf %252, %251 : vector<8x32xf32>
    %cst_62 = arith.constant 1.000000e+00 : f32
    %254 = vector.broadcast %cst_62 : f32 to vector<8x32xf32>
    %255 = arith.subf %253, %254 : vector<8x32xf32>
    %256 = vector.extract_strided_slice %248 {offsets = [0, 96], sizes = [8, 32], strides = [1, 1]} : vector<8x128xf32> to vector<8x32xf32>
    %257 = arith.mulf %250, %189 : vector<8x32xf32>
    %258 = arith.mulf %249, %255 : vector<8x32xf32>
    %259 = arith.addf %257, %258 : vector<8x32xf32>
    %260 = math.tanh %259 : vector<8x32xf32>
    %261 = arith.mulf %256, %260 : vector<8x32xf32>
    %262 = arith.truncf %237 : vector<8x32xf32> to vector<8x32xbf16>
    %cst_63 = arith.constant dense<0.000000e+00> : vector<8x128xf32>
    %263 = tpu.matmul %262, %8, %cst_63 {dimension_numbers = #tpu.dot_dimension_numbers<[1], [0], [0], [1], [0, 0, 1, 1], [], []>} : vector<8x32xbf16>, vector<32x128xbf16>, vector<8x128xf32> -> vector<8x128xf32>
    %264 = arith.truncf %215 : vector<8x32xf32> to vector<8x32xbf16>
    %cst_64 = arith.constant dense<0.000000e+00> : vector<8x128xf32>
    %265 = tpu.matmul %264, %3, %cst_64 {dimension_numbers = #tpu.dot_dimension_numbers<[1], [0], [0], [1], [0, 0, 1, 1], [], []>} : vector<8x32xbf16>, vector<32x128xbf16>, vector<8x128xf32> -> vector<8x128xf32>
    %266 = arith.addf %263, %265 : vector<8x128xf32>
    %267 = arith.addf %266, %14 : vector<8x128xf32>
    %268 = arith.negf %267 : vector<8x128xf32>
    %269 = math.exp %268 : vector<8x128xf32>
    %cst_65 = arith.constant 1.000000e+00 : f32
    %270 = vector.broadcast %cst_65 : f32 to vector<8x128xf32>
    %271 = arith.addf %270, %269 : vector<8x128xf32>
    %272 = arith.divf %270, %271 : vector<8x128xf32>
    %273 = vector.extract_strided_slice %272 {offsets = [0, 0], sizes = [8, 32], strides = [1, 1]} : vector<8x128xf32> to vector<8x32xf32>
    %274 = vector.extract_strided_slice %272 {offsets = [0, 32], sizes = [8, 32], strides = [1, 1]} : vector<8x128xf32> to vector<8x32xf32>
    %275 = vector.extract_strided_slice %272 {offsets = [0, 64], sizes = [8, 32], strides = [1, 1]} : vector<8x128xf32> to vector<8x32xf32>
    %cst_66 = arith.constant 2.000000e+00 : f32
    %276 = vector.broadcast %cst_66 : f32 to vector<8x32xf32>
    %277 = arith.mulf %276, %275 : vector<8x32xf32>
    %cst_67 = arith.constant 1.000000e+00 : f32
    %278 = vector.broadcast %cst_67 : f32 to vector<8x32xf32>
    %279 = arith.subf %277, %278 : vector<8x32xf32>
    %280 = vector.extract_strided_slice %272 {offsets = [0, 96], sizes = [8, 32], strides = [1, 1]} : vector<8x128xf32> to vector<8x32xf32>
    %281 = arith.mulf %274, %213 : vector<8x32xf32>
    %282 = arith.mulf %273, %279 : vector<8x32xf32>
    %283 = arith.addf %281, %282 : vector<8x32xf32>
    %284 = math.tanh %283 : vector<8x32xf32>
    %285 = arith.mulf %280, %284 : vector<8x32xf32>
    %286 = vector.extract_strided_slice %23 {offsets = [32, 0], sizes = [8, 128], strides = [1, 1]} : vector<64x128xf32> to vector<8x128xf32>
    %287 = arith.truncf %237 : vector<8x32xf32> to vector<8x32xbf16>
    %cst_68 = arith.constant dense<0.000000e+00> : vector<8x128xf32>
    %288 = tpu.matmul %287, %1, %cst_68 {dimension_numbers = #tpu.dot_dimension_numbers<[1], [0], [0], [1], [0, 0, 1, 1], [], []>} : vector<8x32xbf16>, vector<32x128xbf16>, vector<8x128xf32> -> vector<8x128xf32>
    %289 = arith.addf %286, %288 : vector<8x128xf32>
    %290 = arith.negf %289 : vector<8x128xf32>
    %291 = math.exp %290 : vector<8x128xf32>
    %cst_69 = arith.constant 1.000000e+00 : f32
    %292 = vector.broadcast %cst_69 : f32 to vector<8x128xf32>
    %293 = arith.addf %292, %291 : vector<8x128xf32>
    %294 = arith.divf %292, %293 : vector<8x128xf32>
    %295 = vector.extract_strided_slice %294 {offsets = [0, 0], sizes = [8, 32], strides = [1, 1]} : vector<8x128xf32> to vector<8x32xf32>
    %296 = vector.extract_strided_slice %294 {offsets = [0, 32], sizes = [8, 32], strides = [1, 1]} : vector<8x128xf32> to vector<8x32xf32>
    %297 = vector.extract_strided_slice %294 {offsets = [0, 64], sizes = [8, 32], strides = [1, 1]} : vector<8x128xf32> to vector<8x32xf32>
    %cst_70 = arith.constant 2.000000e+00 : f32
    %298 = vector.broadcast %cst_70 : f32 to vector<8x32xf32>
    %299 = arith.mulf %298, %297 : vector<8x32xf32>
    %cst_71 = arith.constant 1.000000e+00 : f32
    %300 = vector.broadcast %cst_71 : f32 to vector<8x32xf32>
    %301 = arith.subf %299, %300 : vector<8x32xf32>
    %302 = vector.extract_strided_slice %294 {offsets = [0, 96], sizes = [8, 32], strides = [1, 1]} : vector<8x128xf32> to vector<8x32xf32>
    %303 = arith.mulf %296, %235 : vector<8x32xf32>
    %304 = arith.mulf %295, %301 : vector<8x32xf32>
    %305 = arith.addf %303, %304 : vector<8x32xf32>
    %306 = math.tanh %305 : vector<8x32xf32>
    %307 = arith.mulf %302, %306 : vector<8x32xf32>
    %308 = arith.truncf %285 : vector<8x32xf32> to vector<8x32xbf16>
    %cst_72 = arith.constant dense<0.000000e+00> : vector<8x128xf32>
    %309 = tpu.matmul %308, %10, %cst_72 {dimension_numbers = #tpu.dot_dimension_numbers<[1], [0], [0], [1], [0, 0, 1, 1], [], []>} : vector<8x32xbf16>, vector<32x128xbf16>, vector<8x128xf32> -> vector<8x128xf32>
    %310 = arith.truncf %261 : vector<8x32xf32> to vector<8x32xbf16>
    %cst_73 = arith.constant dense<0.000000e+00> : vector<8x128xf32>
    %311 = tpu.matmul %310, %5, %cst_73 {dimension_numbers = #tpu.dot_dimension_numbers<[1], [0], [0], [1], [0, 0, 1, 1], [], []>} : vector<8x32xbf16>, vector<32x128xbf16>, vector<8x128xf32> -> vector<8x128xf32>
    %312 = arith.addf %309, %311 : vector<8x128xf32>
    %313 = arith.addf %312, %17 : vector<8x128xf32>
    %314 = arith.negf %313 : vector<8x128xf32>
    %315 = math.exp %314 : vector<8x128xf32>
    %cst_74 = arith.constant 1.000000e+00 : f32
    %316 = vector.broadcast %cst_74 : f32 to vector<8x128xf32>
    %317 = arith.addf %316, %315 : vector<8x128xf32>
    %318 = arith.divf %316, %317 : vector<8x128xf32>
    %319 = vector.extract_strided_slice %318 {offsets = [0, 0], sizes = [8, 32], strides = [1, 1]} : vector<8x128xf32> to vector<8x32xf32>
    %320 = vector.extract_strided_slice %318 {offsets = [0, 32], sizes = [8, 32], strides = [1, 1]} : vector<8x128xf32> to vector<8x32xf32>
    %321 = vector.extract_strided_slice %318 {offsets = [0, 64], sizes = [8, 32], strides = [1, 1]} : vector<8x128xf32> to vector<8x32xf32>
    %cst_75 = arith.constant 2.000000e+00 : f32
    %322 = vector.broadcast %cst_75 : f32 to vector<8x32xf32>
    %323 = arith.mulf %322, %321 : vector<8x32xf32>
    %cst_76 = arith.constant 1.000000e+00 : f32
    %324 = vector.broadcast %cst_76 : f32 to vector<8x32xf32>
    %325 = arith.subf %323, %324 : vector<8x32xf32>
    %326 = vector.extract_strided_slice %318 {offsets = [0, 96], sizes = [8, 32], strides = [1, 1]} : vector<8x128xf32> to vector<8x32xf32>
    %327 = arith.mulf %320, %259 : vector<8x32xf32>
    %328 = arith.mulf %319, %325 : vector<8x32xf32>
    %329 = arith.addf %327, %328 : vector<8x32xf32>
    %330 = math.tanh %329 : vector<8x32xf32>
    %331 = arith.mulf %326, %330 : vector<8x32xf32>
    %332 = arith.truncf %307 : vector<8x32xf32> to vector<8x32xbf16>
    %cst_77 = arith.constant dense<0.000000e+00> : vector<8x128xf32>
    %333 = tpu.matmul %332, %8, %cst_77 {dimension_numbers = #tpu.dot_dimension_numbers<[1], [0], [0], [1], [0, 0, 1, 1], [], []>} : vector<8x32xbf16>, vector<32x128xbf16>, vector<8x128xf32> -> vector<8x128xf32>
    %334 = arith.truncf %285 : vector<8x32xf32> to vector<8x32xbf16>
    %cst_78 = arith.constant dense<0.000000e+00> : vector<8x128xf32>
    %335 = tpu.matmul %334, %3, %cst_78 {dimension_numbers = #tpu.dot_dimension_numbers<[1], [0], [0], [1], [0, 0, 1, 1], [], []>} : vector<8x32xbf16>, vector<32x128xbf16>, vector<8x128xf32> -> vector<8x128xf32>
    %336 = arith.addf %333, %335 : vector<8x128xf32>
    %337 = arith.addf %336, %14 : vector<8x128xf32>
    %338 = arith.negf %337 : vector<8x128xf32>
    %339 = math.exp %338 : vector<8x128xf32>
    %cst_79 = arith.constant 1.000000e+00 : f32
    %340 = vector.broadcast %cst_79 : f32 to vector<8x128xf32>
    %341 = arith.addf %340, %339 : vector<8x128xf32>
    %342 = arith.divf %340, %341 : vector<8x128xf32>
    %343 = vector.extract_strided_slice %342 {offsets = [0, 0], sizes = [8, 32], strides = [1, 1]} : vector<8x128xf32> to vector<8x32xf32>
    %344 = vector.extract_strided_slice %342 {offsets = [0, 32], sizes = [8, 32], strides = [1, 1]} : vector<8x128xf32> to vector<8x32xf32>
    %345 = vector.extract_strided_slice %342 {offsets = [0, 64], sizes = [8, 32], strides = [1, 1]} : vector<8x128xf32> to vector<8x32xf32>
    %cst_80 = arith.constant 2.000000e+00 : f32
    %346 = vector.broadcast %cst_80 : f32 to vector<8x32xf32>
    %347 = arith.mulf %346, %345 : vector<8x32xf32>
    %cst_81 = arith.constant 1.000000e+00 : f32
    %348 = vector.broadcast %cst_81 : f32 to vector<8x32xf32>
    %349 = arith.subf %347, %348 : vector<8x32xf32>
    %350 = vector.extract_strided_slice %342 {offsets = [0, 96], sizes = [8, 32], strides = [1, 1]} : vector<8x128xf32> to vector<8x32xf32>
    %351 = arith.mulf %344, %283 : vector<8x32xf32>
    %352 = arith.mulf %343, %349 : vector<8x32xf32>
    %353 = arith.addf %351, %352 : vector<8x32xf32>
    %354 = math.tanh %353 : vector<8x32xf32>
    %355 = arith.mulf %350, %354 : vector<8x32xf32>
    %356 = vector.extract_strided_slice %23 {offsets = [40, 0], sizes = [8, 128], strides = [1, 1]} : vector<64x128xf32> to vector<8x128xf32>
    %357 = arith.truncf %307 : vector<8x32xf32> to vector<8x32xbf16>
    %cst_82 = arith.constant dense<0.000000e+00> : vector<8x128xf32>
    %358 = tpu.matmul %357, %1, %cst_82 {dimension_numbers = #tpu.dot_dimension_numbers<[1], [0], [0], [1], [0, 0, 1, 1], [], []>} : vector<8x32xbf16>, vector<32x128xbf16>, vector<8x128xf32> -> vector<8x128xf32>
    %359 = arith.addf %356, %358 : vector<8x128xf32>
    %360 = arith.negf %359 : vector<8x128xf32>
    %361 = math.exp %360 : vector<8x128xf32>
    %cst_83 = arith.constant 1.000000e+00 : f32
    %362 = vector.broadcast %cst_83 : f32 to vector<8x128xf32>
    %363 = arith.addf %362, %361 : vector<8x128xf32>
    %364 = arith.divf %362, %363 : vector<8x128xf32>
    %365 = vector.extract_strided_slice %364 {offsets = [0, 0], sizes = [8, 32], strides = [1, 1]} : vector<8x128xf32> to vector<8x32xf32>
    %366 = vector.extract_strided_slice %364 {offsets = [0, 32], sizes = [8, 32], strides = [1, 1]} : vector<8x128xf32> to vector<8x32xf32>
    %367 = vector.extract_strided_slice %364 {offsets = [0, 64], sizes = [8, 32], strides = [1, 1]} : vector<8x128xf32> to vector<8x32xf32>
    %cst_84 = arith.constant 2.000000e+00 : f32
    %368 = vector.broadcast %cst_84 : f32 to vector<8x32xf32>
    %369 = arith.mulf %368, %367 : vector<8x32xf32>
    %cst_85 = arith.constant 1.000000e+00 : f32
    %370 = vector.broadcast %cst_85 : f32 to vector<8x32xf32>
    %371 = arith.subf %369, %370 : vector<8x32xf32>
    %372 = vector.extract_strided_slice %364 {offsets = [0, 96], sizes = [8, 32], strides = [1, 1]} : vector<8x128xf32> to vector<8x32xf32>
    %373 = arith.mulf %366, %305 : vector<8x32xf32>
    %374 = arith.mulf %365, %371 : vector<8x32xf32>
    %375 = arith.addf %373, %374 : vector<8x32xf32>
    %376 = math.tanh %375 : vector<8x32xf32>
    %377 = arith.mulf %372, %376 : vector<8x32xf32>
    %378 = arith.truncf %355 : vector<8x32xf32> to vector<8x32xbf16>
    %cst_86 = arith.constant dense<0.000000e+00> : vector<8x128xf32>
    %379 = tpu.matmul %378, %10, %cst_86 {dimension_numbers = #tpu.dot_dimension_numbers<[1], [0], [0], [1], [0, 0, 1, 1], [], []>} : vector<8x32xbf16>, vector<32x128xbf16>, vector<8x128xf32> -> vector<8x128xf32>
    %380 = arith.truncf %331 : vector<8x32xf32> to vector<8x32xbf16>
    %cst_87 = arith.constant dense<0.000000e+00> : vector<8x128xf32>
    %381 = tpu.matmul %380, %5, %cst_87 {dimension_numbers = #tpu.dot_dimension_numbers<[1], [0], [0], [1], [0, 0, 1, 1], [], []>} : vector<8x32xbf16>, vector<32x128xbf16>, vector<8x128xf32> -> vector<8x128xf32>
    %382 = arith.addf %379, %381 : vector<8x128xf32>
    %383 = arith.addf %382, %17 : vector<8x128xf32>
    %384 = arith.negf %383 : vector<8x128xf32>
    %385 = math.exp %384 : vector<8x128xf32>
    %cst_88 = arith.constant 1.000000e+00 : f32
    %386 = vector.broadcast %cst_88 : f32 to vector<8x128xf32>
    %387 = arith.addf %386, %385 : vector<8x128xf32>
    %388 = arith.divf %386, %387 : vector<8x128xf32>
    %389 = vector.extract_strided_slice %388 {offsets = [0, 0], sizes = [8, 32], strides = [1, 1]} : vector<8x128xf32> to vector<8x32xf32>
    %390 = vector.extract_strided_slice %388 {offsets = [0, 32], sizes = [8, 32], strides = [1, 1]} : vector<8x128xf32> to vector<8x32xf32>
    %391 = vector.extract_strided_slice %388 {offsets = [0, 64], sizes = [8, 32], strides = [1, 1]} : vector<8x128xf32> to vector<8x32xf32>
    %cst_89 = arith.constant 2.000000e+00 : f32
    %392 = vector.broadcast %cst_89 : f32 to vector<8x32xf32>
    %393 = arith.mulf %392, %391 : vector<8x32xf32>
    %cst_90 = arith.constant 1.000000e+00 : f32
    %394 = vector.broadcast %cst_90 : f32 to vector<8x32xf32>
    %395 = arith.subf %393, %394 : vector<8x32xf32>
    %396 = vector.extract_strided_slice %388 {offsets = [0, 96], sizes = [8, 32], strides = [1, 1]} : vector<8x128xf32> to vector<8x32xf32>
    %397 = arith.mulf %390, %329 : vector<8x32xf32>
    %398 = arith.mulf %389, %395 : vector<8x32xf32>
    %399 = arith.addf %397, %398 : vector<8x32xf32>
    %400 = math.tanh %399 : vector<8x32xf32>
    %401 = arith.mulf %396, %400 : vector<8x32xf32>
    %402 = arith.truncf %377 : vector<8x32xf32> to vector<8x32xbf16>
    %cst_91 = arith.constant dense<0.000000e+00> : vector<8x128xf32>
    %403 = tpu.matmul %402, %8, %cst_91 {dimension_numbers = #tpu.dot_dimension_numbers<[1], [0], [0], [1], [0, 0, 1, 1], [], []>} : vector<8x32xbf16>, vector<32x128xbf16>, vector<8x128xf32> -> vector<8x128xf32>
    %404 = arith.truncf %355 : vector<8x32xf32> to vector<8x32xbf16>
    %cst_92 = arith.constant dense<0.000000e+00> : vector<8x128xf32>
    %405 = tpu.matmul %404, %3, %cst_92 {dimension_numbers = #tpu.dot_dimension_numbers<[1], [0], [0], [1], [0, 0, 1, 1], [], []>} : vector<8x32xbf16>, vector<32x128xbf16>, vector<8x128xf32> -> vector<8x128xf32>
    %406 = arith.addf %403, %405 : vector<8x128xf32>
    %407 = arith.addf %406, %14 : vector<8x128xf32>
    %408 = arith.negf %407 : vector<8x128xf32>
    %409 = math.exp %408 : vector<8x128xf32>
    %cst_93 = arith.constant 1.000000e+00 : f32
    %410 = vector.broadcast %cst_93 : f32 to vector<8x128xf32>
    %411 = arith.addf %410, %409 : vector<8x128xf32>
    %412 = arith.divf %410, %411 : vector<8x128xf32>
    %413 = vector.extract_strided_slice %412 {offsets = [0, 0], sizes = [8, 32], strides = [1, 1]} : vector<8x128xf32> to vector<8x32xf32>
    %414 = vector.extract_strided_slice %412 {offsets = [0, 32], sizes = [8, 32], strides = [1, 1]} : vector<8x128xf32> to vector<8x32xf32>
    %415 = vector.extract_strided_slice %412 {offsets = [0, 64], sizes = [8, 32], strides = [1, 1]} : vector<8x128xf32> to vector<8x32xf32>
    %cst_94 = arith.constant 2.000000e+00 : f32
    %416 = vector.broadcast %cst_94 : f32 to vector<8x32xf32>
    %417 = arith.mulf %416, %415 : vector<8x32xf32>
    %cst_95 = arith.constant 1.000000e+00 : f32
    %418 = vector.broadcast %cst_95 : f32 to vector<8x32xf32>
    %419 = arith.subf %417, %418 : vector<8x32xf32>
    %420 = vector.extract_strided_slice %412 {offsets = [0, 96], sizes = [8, 32], strides = [1, 1]} : vector<8x128xf32> to vector<8x32xf32>
    %421 = arith.mulf %414, %353 : vector<8x32xf32>
    %422 = arith.mulf %413, %419 : vector<8x32xf32>
    %423 = arith.addf %421, %422 : vector<8x32xf32>
    %424 = math.tanh %423 : vector<8x32xf32>
    %425 = arith.mulf %420, %424 : vector<8x32xf32>
    %426 = vector.extract_strided_slice %23 {offsets = [48, 0], sizes = [8, 128], strides = [1, 1]} : vector<64x128xf32> to vector<8x128xf32>
    %427 = arith.truncf %377 : vector<8x32xf32> to vector<8x32xbf16>
    %cst_96 = arith.constant dense<0.000000e+00> : vector<8x128xf32>
    %428 = tpu.matmul %427, %1, %cst_96 {dimension_numbers = #tpu.dot_dimension_numbers<[1], [0], [0], [1], [0, 0, 1, 1], [], []>} : vector<8x32xbf16>, vector<32x128xbf16>, vector<8x128xf32> -> vector<8x128xf32>
    %429 = arith.addf %426, %428 : vector<8x128xf32>
    %430 = arith.negf %429 : vector<8x128xf32>
    %431 = math.exp %430 : vector<8x128xf32>
    %cst_97 = arith.constant 1.000000e+00 : f32
    %432 = vector.broadcast %cst_97 : f32 to vector<8x128xf32>
    %433 = arith.addf %432, %431 : vector<8x128xf32>
    %434 = arith.divf %432, %433 : vector<8x128xf32>
    %435 = vector.extract_strided_slice %434 {offsets = [0, 0], sizes = [8, 32], strides = [1, 1]} : vector<8x128xf32> to vector<8x32xf32>
    %436 = vector.extract_strided_slice %434 {offsets = [0, 32], sizes = [8, 32], strides = [1, 1]} : vector<8x128xf32> to vector<8x32xf32>
    %437 = vector.extract_strided_slice %434 {offsets = [0, 64], sizes = [8, 32], strides = [1, 1]} : vector<8x128xf32> to vector<8x32xf32>
    %cst_98 = arith.constant 2.000000e+00 : f32
    %438 = vector.broadcast %cst_98 : f32 to vector<8x32xf32>
    %439 = arith.mulf %438, %437 : vector<8x32xf32>
    %cst_99 = arith.constant 1.000000e+00 : f32
    %440 = vector.broadcast %cst_99 : f32 to vector<8x32xf32>
    %441 = arith.subf %439, %440 : vector<8x32xf32>
    %442 = vector.extract_strided_slice %434 {offsets = [0, 96], sizes = [8, 32], strides = [1, 1]} : vector<8x128xf32> to vector<8x32xf32>
    %443 = arith.mulf %436, %375 : vector<8x32xf32>
    %444 = arith.mulf %435, %441 : vector<8x32xf32>
    %445 = arith.addf %443, %444 : vector<8x32xf32>
    %446 = math.tanh %445 : vector<8x32xf32>
    %447 = arith.mulf %442, %446 : vector<8x32xf32>
    %448 = arith.truncf %425 : vector<8x32xf32> to vector<8x32xbf16>
    %cst_100 = arith.constant dense<0.000000e+00> : vector<8x128xf32>
    %449 = tpu.matmul %448, %10, %cst_100 {dimension_numbers = #tpu.dot_dimension_numbers<[1], [0], [0], [1], [0, 0, 1, 1], [], []>} : vector<8x32xbf16>, vector<32x128xbf16>, vector<8x128xf32> -> vector<8x128xf32>
    %450 = arith.truncf %401 : vector<8x32xf32> to vector<8x32xbf16>
    %cst_101 = arith.constant dense<0.000000e+00> : vector<8x128xf32>
    %451 = tpu.matmul %450, %5, %cst_101 {dimension_numbers = #tpu.dot_dimension_numbers<[1], [0], [0], [1], [0, 0, 1, 1], [], []>} : vector<8x32xbf16>, vector<32x128xbf16>, vector<8x128xf32> -> vector<8x128xf32>
    %452 = arith.addf %449, %451 : vector<8x128xf32>
    %453 = arith.addf %452, %17 : vector<8x128xf32>
    %454 = arith.negf %453 : vector<8x128xf32>
    %455 = math.exp %454 : vector<8x128xf32>
    %cst_102 = arith.constant 1.000000e+00 : f32
    %456 = vector.broadcast %cst_102 : f32 to vector<8x128xf32>
    %457 = arith.addf %456, %455 : vector<8x128xf32>
    %458 = arith.divf %456, %457 : vector<8x128xf32>
    %459 = vector.extract_strided_slice %458 {offsets = [0, 0], sizes = [8, 32], strides = [1, 1]} : vector<8x128xf32> to vector<8x32xf32>
    %460 = vector.extract_strided_slice %458 {offsets = [0, 32], sizes = [8, 32], strides = [1, 1]} : vector<8x128xf32> to vector<8x32xf32>
    %461 = vector.extract_strided_slice %458 {offsets = [0, 64], sizes = [8, 32], strides = [1, 1]} : vector<8x128xf32> to vector<8x32xf32>
    %cst_103 = arith.constant 2.000000e+00 : f32
    %462 = vector.broadcast %cst_103 : f32 to vector<8x32xf32>
    %463 = arith.mulf %462, %461 : vector<8x32xf32>
    %cst_104 = arith.constant 1.000000e+00 : f32
    %464 = vector.broadcast %cst_104 : f32 to vector<8x32xf32>
    %465 = arith.subf %463, %464 : vector<8x32xf32>
    %466 = vector.extract_strided_slice %458 {offsets = [0, 96], sizes = [8, 32], strides = [1, 1]} : vector<8x128xf32> to vector<8x32xf32>
    %467 = arith.mulf %460, %399 : vector<8x32xf32>
    %468 = arith.mulf %459, %465 : vector<8x32xf32>
    %469 = arith.addf %467, %468 : vector<8x32xf32>
    %470 = math.tanh %469 : vector<8x32xf32>
    %471 = arith.mulf %466, %470 : vector<8x32xf32>
    %472 = arith.truncf %447 : vector<8x32xf32> to vector<8x32xbf16>
    %cst_105 = arith.constant dense<0.000000e+00> : vector<8x128xf32>
    %473 = tpu.matmul %472, %8, %cst_105 {dimension_numbers = #tpu.dot_dimension_numbers<[1], [0], [0], [1], [0, 0, 1, 1], [], []>} : vector<8x32xbf16>, vector<32x128xbf16>, vector<8x128xf32> -> vector<8x128xf32>
    %474 = arith.truncf %425 : vector<8x32xf32> to vector<8x32xbf16>
    %cst_106 = arith.constant dense<0.000000e+00> : vector<8x128xf32>
    %475 = tpu.matmul %474, %3, %cst_106 {dimension_numbers = #tpu.dot_dimension_numbers<[1], [0], [0], [1], [0, 0, 1, 1], [], []>} : vector<8x32xbf16>, vector<32x128xbf16>, vector<8x128xf32> -> vector<8x128xf32>
    %476 = arith.addf %473, %475 : vector<8x128xf32>
    %477 = arith.addf %476, %14 : vector<8x128xf32>
    %478 = arith.negf %477 : vector<8x128xf32>
    %479 = math.exp %478 : vector<8x128xf32>
    %cst_107 = arith.constant 1.000000e+00 : f32
    %480 = vector.broadcast %cst_107 : f32 to vector<8x128xf32>
    %481 = arith.addf %480, %479 : vector<8x128xf32>
    %482 = arith.divf %480, %481 : vector<8x128xf32>
    %483 = vector.extract_strided_slice %482 {offsets = [0, 0], sizes = [8, 32], strides = [1, 1]} : vector<8x128xf32> to vector<8x32xf32>
    %484 = vector.extract_strided_slice %482 {offsets = [0, 32], sizes = [8, 32], strides = [1, 1]} : vector<8x128xf32> to vector<8x32xf32>
    %485 = vector.extract_strided_slice %482 {offsets = [0, 64], sizes = [8, 32], strides = [1, 1]} : vector<8x128xf32> to vector<8x32xf32>
    %cst_108 = arith.constant 2.000000e+00 : f32
    %486 = vector.broadcast %cst_108 : f32 to vector<8x32xf32>
    %487 = arith.mulf %486, %485 : vector<8x32xf32>
    %cst_109 = arith.constant 1.000000e+00 : f32
    %488 = vector.broadcast %cst_109 : f32 to vector<8x32xf32>
    %489 = arith.subf %487, %488 : vector<8x32xf32>
    %490 = vector.extract_strided_slice %482 {offsets = [0, 96], sizes = [8, 32], strides = [1, 1]} : vector<8x128xf32> to vector<8x32xf32>
    %491 = arith.mulf %484, %423 : vector<8x32xf32>
    %492 = arith.mulf %483, %489 : vector<8x32xf32>
    %493 = arith.addf %491, %492 : vector<8x32xf32>
    %494 = math.tanh %493 : vector<8x32xf32>
    %495 = arith.mulf %490, %494 : vector<8x32xf32>
    %496 = vector.extract_strided_slice %23 {offsets = [56, 0], sizes = [8, 128], strides = [1, 1]} : vector<64x128xf32> to vector<8x128xf32>
    %497 = arith.truncf %447 : vector<8x32xf32> to vector<8x32xbf16>
    %cst_110 = arith.constant dense<0.000000e+00> : vector<8x128xf32>
    %498 = tpu.matmul %497, %1, %cst_110 {dimension_numbers = #tpu.dot_dimension_numbers<[1], [0], [0], [1], [0, 0, 1, 1], [], []>} : vector<8x32xbf16>, vector<32x128xbf16>, vector<8x128xf32> -> vector<8x128xf32>
    %499 = arith.addf %496, %498 : vector<8x128xf32>
    %500 = arith.negf %499 : vector<8x128xf32>
    %501 = math.exp %500 : vector<8x128xf32>
    %cst_111 = arith.constant 1.000000e+00 : f32
    %502 = vector.broadcast %cst_111 : f32 to vector<8x128xf32>
    %503 = arith.addf %502, %501 : vector<8x128xf32>
    %504 = arith.divf %502, %503 : vector<8x128xf32>
    %505 = vector.extract_strided_slice %504 {offsets = [0, 0], sizes = [8, 32], strides = [1, 1]} : vector<8x128xf32> to vector<8x32xf32>
    %506 = vector.extract_strided_slice %504 {offsets = [0, 32], sizes = [8, 32], strides = [1, 1]} : vector<8x128xf32> to vector<8x32xf32>
    %507 = vector.extract_strided_slice %504 {offsets = [0, 64], sizes = [8, 32], strides = [1, 1]} : vector<8x128xf32> to vector<8x32xf32>
    %cst_112 = arith.constant 2.000000e+00 : f32
    %508 = vector.broadcast %cst_112 : f32 to vector<8x32xf32>
    %509 = arith.mulf %508, %507 : vector<8x32xf32>
    %cst_113 = arith.constant 1.000000e+00 : f32
    %510 = vector.broadcast %cst_113 : f32 to vector<8x32xf32>
    %511 = arith.subf %509, %510 : vector<8x32xf32>
    %512 = vector.extract_strided_slice %504 {offsets = [0, 96], sizes = [8, 32], strides = [1, 1]} : vector<8x128xf32> to vector<8x32xf32>
    %513 = arith.mulf %506, %445 : vector<8x32xf32>
    %514 = arith.mulf %505, %511 : vector<8x32xf32>
    %515 = arith.addf %513, %514 : vector<8x32xf32>
    %516 = math.tanh %515 : vector<8x32xf32>
    %517 = arith.mulf %512, %516 : vector<8x32xf32>
    %518 = arith.truncf %495 : vector<8x32xf32> to vector<8x32xbf16>
    %cst_114 = arith.constant dense<0.000000e+00> : vector<8x128xf32>
    %519 = tpu.matmul %518, %10, %cst_114 {dimension_numbers = #tpu.dot_dimension_numbers<[1], [0], [0], [1], [0, 0, 1, 1], [], []>} : vector<8x32xbf16>, vector<32x128xbf16>, vector<8x128xf32> -> vector<8x128xf32>
    %520 = arith.truncf %471 : vector<8x32xf32> to vector<8x32xbf16>
    %cst_115 = arith.constant dense<0.000000e+00> : vector<8x128xf32>
    %521 = tpu.matmul %520, %5, %cst_115 {dimension_numbers = #tpu.dot_dimension_numbers<[1], [0], [0], [1], [0, 0, 1, 1], [], []>} : vector<8x32xbf16>, vector<32x128xbf16>, vector<8x128xf32> -> vector<8x128xf32>
    %522 = arith.addf %519, %521 : vector<8x128xf32>
    %523 = arith.addf %522, %17 : vector<8x128xf32>
    %524 = arith.negf %523 : vector<8x128xf32>
    %525 = math.exp %524 : vector<8x128xf32>
    %cst_116 = arith.constant 1.000000e+00 : f32
    %526 = vector.broadcast %cst_116 : f32 to vector<8x128xf32>
    %527 = arith.addf %526, %525 : vector<8x128xf32>
    %528 = arith.divf %526, %527 : vector<8x128xf32>
    %529 = vector.extract_strided_slice %528 {offsets = [0, 0], sizes = [8, 32], strides = [1, 1]} : vector<8x128xf32> to vector<8x32xf32>
    %530 = vector.extract_strided_slice %528 {offsets = [0, 32], sizes = [8, 32], strides = [1, 1]} : vector<8x128xf32> to vector<8x32xf32>
    %531 = vector.extract_strided_slice %528 {offsets = [0, 64], sizes = [8, 32], strides = [1, 1]} : vector<8x128xf32> to vector<8x32xf32>
    %cst_117 = arith.constant 2.000000e+00 : f32
    %532 = vector.broadcast %cst_117 : f32 to vector<8x32xf32>
    %533 = arith.mulf %532, %531 : vector<8x32xf32>
    %cst_118 = arith.constant 1.000000e+00 : f32
    %534 = vector.broadcast %cst_118 : f32 to vector<8x32xf32>
    %535 = arith.subf %533, %534 : vector<8x32xf32>
    %536 = vector.extract_strided_slice %528 {offsets = [0, 96], sizes = [8, 32], strides = [1, 1]} : vector<8x128xf32> to vector<8x32xf32>
    %537 = arith.mulf %530, %469 : vector<8x32xf32>
    %538 = arith.mulf %529, %535 : vector<8x32xf32>
    %539 = arith.addf %537, %538 : vector<8x32xf32>
    %540 = math.tanh %539 : vector<8x32xf32>
    %541 = arith.mulf %536, %540 : vector<8x32xf32>
    %542 = arith.truncf %517 : vector<8x32xf32> to vector<8x32xbf16>
    %cst_119 = arith.constant dense<0.000000e+00> : vector<8x128xf32>
    %543 = tpu.matmul %542, %8, %cst_119 {dimension_numbers = #tpu.dot_dimension_numbers<[1], [0], [0], [1], [0, 0, 1, 1], [], []>} : vector<8x32xbf16>, vector<32x128xbf16>, vector<8x128xf32> -> vector<8x128xf32>
    %544 = arith.truncf %495 : vector<8x32xf32> to vector<8x32xbf16>
    %cst_120 = arith.constant dense<0.000000e+00> : vector<8x128xf32>
    %545 = tpu.matmul %544, %3, %cst_120 {dimension_numbers = #tpu.dot_dimension_numbers<[1], [0], [0], [1], [0, 0, 1, 1], [], []>} : vector<8x32xbf16>, vector<32x128xbf16>, vector<8x128xf32> -> vector<8x128xf32>
    %546 = arith.addf %543, %545 : vector<8x128xf32>
    %547 = arith.addf %546, %14 : vector<8x128xf32>
    %548 = arith.negf %547 : vector<8x128xf32>
    %549 = math.exp %548 : vector<8x128xf32>
    %cst_121 = arith.constant 1.000000e+00 : f32
    %550 = vector.broadcast %cst_121 : f32 to vector<8x128xf32>
    %551 = arith.addf %550, %549 : vector<8x128xf32>
    %552 = arith.divf %550, %551 : vector<8x128xf32>
    %553 = vector.extract_strided_slice %552 {offsets = [0, 0], sizes = [8, 32], strides = [1, 1]} : vector<8x128xf32> to vector<8x32xf32>
    %554 = vector.extract_strided_slice %552 {offsets = [0, 32], sizes = [8, 32], strides = [1, 1]} : vector<8x128xf32> to vector<8x32xf32>
    %555 = vector.extract_strided_slice %552 {offsets = [0, 64], sizes = [8, 32], strides = [1, 1]} : vector<8x128xf32> to vector<8x32xf32>
    %cst_122 = arith.constant 2.000000e+00 : f32
    %556 = vector.broadcast %cst_122 : f32 to vector<8x32xf32>
    %557 = arith.mulf %556, %555 : vector<8x32xf32>
    %cst_123 = arith.constant 1.000000e+00 : f32
    %558 = vector.broadcast %cst_123 : f32 to vector<8x32xf32>
    %559 = arith.subf %557, %558 : vector<8x32xf32>
    %560 = vector.extract_strided_slice %552 {offsets = [0, 96], sizes = [8, 32], strides = [1, 1]} : vector<8x128xf32> to vector<8x32xf32>
    %561 = arith.mulf %554, %493 : vector<8x32xf32>
    %562 = arith.mulf %553, %559 : vector<8x32xf32>
    %563 = arith.addf %561, %562 : vector<8x32xf32>
    %564 = math.tanh %563 : vector<8x32xf32>
    %565 = arith.mulf %560, %564 : vector<8x32xf32>
    %566 = arith.truncf %565 : vector<8x32xf32> to vector<8x32xbf16>
    %cst_124 = arith.constant dense<0.000000e+00> : vector<8x128xf32>
    %567 = tpu.matmul %566, %10, %cst_124 {dimension_numbers = #tpu.dot_dimension_numbers<[1], [0], [0], [1], [0, 0, 1, 1], [], []>} : vector<8x32xbf16>, vector<32x128xbf16>, vector<8x128xf32> -> vector<8x128xf32>
    %568 = arith.truncf %541 : vector<8x32xf32> to vector<8x32xbf16>
    %cst_125 = arith.constant dense<0.000000e+00> : vector<8x128xf32>
    %569 = tpu.matmul %568, %5, %cst_125 {dimension_numbers = #tpu.dot_dimension_numbers<[1], [0], [0], [1], [0, 0, 1, 1], [], []>} : vector<8x32xbf16>, vector<32x128xbf16>, vector<8x128xf32> -> vector<8x128xf32>
    %570 = arith.addf %567, %569 : vector<8x128xf32>
    %571 = arith.addf %570, %17 : vector<8x128xf32>
    %572 = arith.negf %571 : vector<8x128xf32>
    %573 = math.exp %572 : vector<8x128xf32>
    %cst_126 = arith.constant 1.000000e+00 : f32
    %574 = vector.broadcast %cst_126 : f32 to vector<8x128xf32>
    %575 = arith.addf %574, %573 : vector<8x128xf32>
    %576 = arith.divf %574, %575 : vector<8x128xf32>
    %577 = vector.extract_strided_slice %576 {offsets = [0, 0], sizes = [8, 32], strides = [1, 1]} : vector<8x128xf32> to vector<8x32xf32>
    %578 = vector.extract_strided_slice %576 {offsets = [0, 32], sizes = [8, 32], strides = [1, 1]} : vector<8x128xf32> to vector<8x32xf32>
    %579 = vector.extract_strided_slice %576 {offsets = [0, 64], sizes = [8, 32], strides = [1, 1]} : vector<8x128xf32> to vector<8x32xf32>
    %cst_127 = arith.constant 2.000000e+00 : f32
    %580 = vector.broadcast %cst_127 : f32 to vector<8x32xf32>
    %581 = arith.mulf %580, %579 : vector<8x32xf32>
    %cst_128 = arith.constant 1.000000e+00 : f32
    %582 = vector.broadcast %cst_128 : f32 to vector<8x32xf32>
    %583 = arith.subf %581, %582 : vector<8x32xf32>
    %584 = vector.extract_strided_slice %576 {offsets = [0, 96], sizes = [8, 32], strides = [1, 1]} : vector<8x128xf32> to vector<8x32xf32>
    %585 = arith.mulf %578, %539 : vector<8x32xf32>
    %586 = arith.mulf %577, %583 : vector<8x32xf32>
    %587 = arith.addf %585, %586 : vector<8x32xf32>
    %588 = math.tanh %587 : vector<8x32xf32>
    %589 = arith.mulf %584, %588 : vector<8x32xf32>
    %c200 = arith.constant 200 : index
    %c0_129 = arith.constant 0 : index
    %590 = vector.load %arg1[%c200, %c0_129] : memref<240x128xf32, #tpu.memory_space<vmem>>, vector<32x128xf32>
    %591 = vector.extract_strided_slice %590 {offsets = [0, 0], sizes = [32, 1], strides = [1, 1]} : vector<32x128xf32> to vector<32x1xf32>
    %c232 = arith.constant 232 : index
    %c0_130 = arith.constant 0 : index
    %592 = vector.load %arg1[%c232, %c0_130] : memref<240x128xf32, #tpu.memory_space<vmem>>, vector<1x128xf32>
    %593 = vector.extract_strided_slice %592 {offsets = [0, 0], sizes = [1, 1], strides = [1, 1]} : vector<1x128xf32> to vector<1x1xf32>
    %cst_131 = arith.constant dense<0.000000e+00> : vector<8x1xf32>
    %594 = tpu.matmul %589, %591, %cst_131 {dimension_numbers = #tpu.dot_dimension_numbers<[1], [0], [0], [1], [0, 0, 1, 1], [], []>} : vector<8x32xf32>, vector<32x1xf32>, vector<8x1xf32> -> vector<8x1xf32>
    %595 = vector.broadcast %593 : vector<1x1xf32> to vector<8x1xf32>
    %596 = arith.addf %594, %595 : vector<8x1xf32>
    %597 = arith.negf %596 : vector<8x1xf32>
    %598 = math.exp %597 : vector<8x1xf32>
    %cst_132 = arith.constant 1.000000e+00 : f32
    %599 = vector.broadcast %cst_132 : f32 to vector<8x1xf32>
    %600 = arith.addf %599, %598 : vector<8x1xf32>
    %601 = arith.divf %599, %600 : vector<8x1xf32>
    %c0_133 = arith.constant 0 : index
    %c0_134 = arith.constant 0 : index
    %602 = vector.load %arg2[%c0_133, %c0_134] : memref<8x1xf32, #tpu.memory_space<vmem>>, vector<8x1xf32>
    tpu.vector_store %arg2[%c0_133, %c0_134], %601 {strides = array<i32>} : memref<8x1xf32, #tpu.memory_space<vmem>>, vector<8x1xf32>,
    return
  }
}

</mosaic_0001>

<bundles_post_ra>
// kernel: forward.1
= control target key start
LH: loop header
LB: loop body
LE: loop exit
PB: predicated region body
PF: predicated region fallthrough
CT: control target
= control target key end

     0   :  { %7 = vsyncpa [#allocation3], 0  ;;  %s3406_s9 = smov [#allocation2]   ;;  %s4009_s0 = inlined_call_operand.vmem [shape: f32[64,16], index: 0, kind: input, shape index: {}]   ;;  %s4010_s1 = inlined_call_operand.hbm [shape: f32[240,128], index: 1, kind: input, shape index: {}]   ;;  %s4011_s2 = inlined_call_operand.vmem [shape: f32[8,1], index: 2, kind: output, shape index: {}]  }
   0x1   :  { %s15_s10 = sshll.u32 %s3406_s9, 4  ;;  %s3382_s13 = scalar_lea.hbm %s4010_s1, 3840  ;;  %s16_s10 = int_to_ptr.vmem [resolvable:$true] %s15_s10 }
   0x2   :  { %p3383_p0 = scmp.ne.s32.totalorder %s4010_s1, %s3382_s13  ;;  %p3386_p1 = scmp.lt.u32.totalorder %s3382_s13, %s4010_s1 }
   0x4   :  { %p3388_p2 = pnand %p3386_p1, %p3383_p0 }
   0x6   :  { %3391 = shalt.err (!%p3388_p2)
}
   0x7   :  { %s3392_s18 = scalar_lea.vmem %s16_s10, 3840  ;;  %p3397_p4 = scmp.lt.s32.totalorder %s16_s10, %s16_s10 }
   0x8   :  { %p3393_p3 = scmp.ne.s32.totalorder %s16_s10, %s3392_s18  ;;  %p3398_p5 = scmp.lt.s32.totalorder %s3392_s18, %s3392_s18 }
   0xa   :  { %p3399_p6 = por %p3398_p5, %p3397_p4 }
   0xc   :  { %p3400_p7 = pnand %p3399_p6, %p3393_p3 }
   0xe   :  { %3403 = shalt.err (!%p3400_p7)
}
   0xf   :  { %s3407_s19 = smov 128   ;;  %s3408_s20 = smov 8  }
  0x10   :  { %21 = dma.hbm_to_vmem [thread:$0]  %s4010_s1, 3840, %s16_s10, [#allocation3], %s3407_s19, %s3407_s19, %s3408_s20  }
  0x11   :  { %3404 = dma.done.wait [#allocation3], 3840  }
  0x12   :  { %3405 = vsyncadd [#allocation3], 4294963456  ;;  %v3409_v0 = vmov 0.0   ;;  %vm3410_vm0 = vmmov 0   ;;  %v44_v1 = vld [vmem:[#allocation2] sm:$0xff]  ;;  %v45_v2 = vld [vmem:[#allocation2 + $0x8] sm:$0xff] }
  0x13   :  { %2885 = vmatprep.subr.bf16.mxu1 %v3409_v0  ;;  %2889 = vmatprep.mubr.msk.bf16.mxu1 %vm3410_vm0, %v3409_v0  ;;  %v26_v3 = vld [vmem:[#allocation2 + $0x10] sm:$0xff]  ;;  %v81_v4 = vpack.c.bf16 %v45_v2, %v44_v1  ;;  %v27_v5 = vld [vmem:[#allocation2 + $0x18] sm:$0xff]  ;;  %v69_v6 = vld [vmem:[%s4009_s0] sm:$0xff]  ;;  %vm86_vm1 = vcmask 130048   ;;  %v3411_v16 = vmov 0   ;;  %s3412_s30 = smov 64  }
  0x14   :  { %v70_v7 = vld [vmem:[%s4009_s0 + $0x8] sm:$0xff]  ;;  %v3451_v8 = vpack.c.bf16 %v27_v5, %v26_v3  ;;  %v71_v10 = vld [vmem:[%s4009_s0 + $0x10] sm:$0xff]  ;;  %v72_v11 = vld [vmem:[%s4009_s0 + $0x18] sm:$0xff]  ;;  %s3413_s3 = smov 32   ;;  %vm164_vm2 = vcmask 261120   ;;  %vm2643_vm3 = vcmask 7168  }
  0x15   :  { %v77_v9 = vpack.c.bf16 %v70_v7, %v69_v6  ;;  %v28_v12 = vld [vmem:[#allocation2 + $0x20] sm:$0xff]  ;;  %2875 = vmatprep.subr.bf16.mxu0 %v81_v4  ;;  %v78_v13 = vpack.c.bf16 %v72_v11, %v71_v10  ;;  %v29_v14 = vld [vmem:[#allocation2 + $0x28] sm:$0xff]  ;;  %v3471_v17 = vld [vmem:[#allocation2 + $0x30] ss:$0 sm:$0xff] }
  0x16   :  { %2886 = vmatpush3.bf16.msra.mxu1 %v3451_v8  ;;  %2876 = vmatpush3.bf16.msra.mxu0 %v81_v4  ;;  %v3460_v15 = vpack.c.bf16 %v29_v14, %v28_v12  ;;  %v46_v39 = vld [vmem:[#allocation2 + $0x38] sm:$0xff]  ;;  %v47_v40 = vld [vmem:[#allocation2 + $0x40] sm:$0xff]  ;;  %v74_v45 = vld [vmem:[%s4009_s0 + $0x28] sm:$0xff] }
  0x17   :  { %2877 = vmatprep.mubr.msk.bf16.mxu0 %vm86_vm1, %v77_v9  ;;  %2887 = vmatprep.subr.bf16.mxu1 %v3409_v0  ;;  %v32_v41 = vld [vmem:[#allocation2 + $0x58] sm:$0xff]  ;;  %v3485_v42 = vpack.c.bf16 %v47_v40, %v46_v39  ;;  %v33_v43 = vld [vmem:[#allocation2 + $0x60] sm:$0xff]  ;;  %v75_v48 = vld [vmem:[%s4009_s0 + $0x30] sm:$0xff] }
  0x18   :  { %2901 = vmatprep.subr.bf16.mxu0 %v3409_v0  ;;  %v73_v44 = vld [vmem:[%s4009_s0 + $0x20] sm:$0xff]  ;;  %v3493_v46 = vpack.c.bf16 %v33_v43, %v32_v41  ;;  %v76_v49 = vld [vmem:[%s4009_s0 + $0x38] sm:$0xff]  ;;  %v34_v50 = vld [vmem:[#allocation2 + $0x68] sm:$0xff] }
  0x19   :  { %2878 = vmatmul.mubr.msk.bf16.vlgmr.msra.gmra.mrb[0].mxu0 %vm86_vm1, %v78_v13  ;;  %v79_v47 = vpack.c.bf16 %v74_v45, %v73_v44  ;;  %v80_v51 = vpack.c.bf16 %v76_v49, %v75_v48  ;;  %v35_v52 = vld [vmem:[#allocation2 + $0x70] sm:$0xff]  ;;  %v48_v53 = vld [vmem:[#allocation2 + $0x48] sm:$0xff]  ;;  %v3542_v9 = vld [vmem:[#allocation2 + $0x78] ss:$0 sm:$0xff] }
  0x1a   :  { %2888 = vmatpush3.bf16.msra.mxu1 %v3460_v15  ;;  %2902 = vmatpush3.bf16.msra.mxu0 %v3485_v42  ;;  %v49_v54 = vld [vmem:[#allocation2 + $0x50] sm:$0xff]  ;;  %v3504_v55 = vpack.c.bf16 %v35_v52, %v34_v50  ;;  %v39_v52 = vld [vmem:[#allocation2 + $0xa8] sm:$0xff] }
  0x1b   :  { %2893 = vmatprep.subr.bf16.mxu1 %v3409_v0  ;;  %2881 = vmatprep.mubr.msk.bf16.mxu0 %vm86_vm1, %v79_v47  ;;  %v3506_v56 = vpack.c.bf16 %v49_v54, %v48_v53  ;;  %v40_v53 = vld [vmem:[#allocation2 + $0xb0] sm:$0xff] }
  0x1c   :  { %2903 = vmatprep.subr.bf16.mxu0 %v3409_v0 }
  0x1d   :  { %2890 = vmatmul.mubr.bf16.vlgmr.msra.gmra.mrb[0].mxu1 %v3411_v16 }
  0x1e   :  { %2897 = vmatprep.mubr.msk.bf16.mxu1 %vm3410_vm0, %v3409_v0  ;;  %2894 = vmatpush3.bf16.msra.mxu1 %v3493_v46 }
  0x1f   :  { %2895 = vmatprep.subr.bf16.mxu1 %v3409_v0  ;;  %2904 = vmatpush3.bf16.msra.mxu0 %v3506_v56 }
  0x20   :  { %2917 = vmatprep.subr.bf16.mxu0 %v3409_v0 }
  0x21   :  { %2882 = vmatmul.mubr.msk.bf16.gmra.mrb[4].mxu0 %vm86_vm1, %v80_v51  ;;  %v38_v51 = vld [vmem:[#allocation2 + $0xa0] sm:$0xff] }
  0x22   :  { %2905 = vmatprep.mubr.msk.bf16.mxu0 %vm3410_vm0, %v3409_v0  ;;  %2896 = vmatpush3.bf16.msra.mxu1 %v3504_v55  ;;  %v3556_v54 = vpack.c.bf16 %v39_v52, %v38_v51 }
  0x23   :  { %2909 = vmatprep.subr.bf16.mxu1 %v3409_v0 }
  0x25   :  { %2898 = vmatmul.mubr.bf16.vlgmr.msra.gmra.mrb[4].mxu1 %v3411_v16 }
  0x26   :  { %2910 = vmatpush3.bf16.msra.mxu1 %v3451_v8  ;;  %2913 = vmatprep.mubr.msk.bf16.mxu1 %vm3410_vm0, %v3409_v0 }
  0x27   :  { %2911 = vmatprep.subr.bf16.mxu1 %v3409_v0 }
  0x2a   :  { %2912 = vmatpush3.bf16.msra.mxu1 %v3460_v15 }
  0x2b   :  { %2925 = vmatprep.subr.bf16.mxu1 %v3409_v0 }
  0xec   :  { %v3473_v18 = vpop.f32.mrb[0].mxu0 }
  0xed   :  { %v133_v19 = vpop.f32.mrb[1].mxu0 }
  0xee   :  { %v134_v20 = vadd.f32 %v3471_v17, %v133_v19  ;;  %v3476_v21 = vpop.f32.mrb[2].mxu0 }
  0xef   :  { %v3478_v22 = vpop.f32.mrb[3].mxu0 }
  0xf0   :  { %v202_v23 = vpop.f32.mrb[0].mxu1  ;;  %v137_v7 = vadd.f32 %v3471_v17, %v3478_v22 }
  0xf1   :  { %v208_v24 = vadd.f32 %v202_v23, %v134_v20  ;;  %v2891_v25 = vpop.f32.mrb[1].mxu1 }
  0xf2   :  { %v205_v26 = vpop.f32.mrb[2].mxu1 }
  0xf3   :  { %v2657_v27 = vmul.f32 -1.442695, %v208_v24  ;;  %v2892_v28 = vpop.f32.mrb[3].mxu1 }
  0xf4   :  { %v3526_v61 = vpop.f32.mrb[4].mxu0 }
  0xf5   :  { %3231 = vpow2.f32 %v2657_v27  ;;  %v3528_v62 = vpop.f32.mrb[5].mxu0 }
  0xf6   :  { %v3530_v63 = vpop.f32.mrb[6].mxu0 }
  0xf7   :  { %v3532_v1 = vpop.f32.mrb[7].mxu0 }
  0xf8   :  { %v269_v2 = vpop.f32.mrb[4].mxu1 }
  0xf9   :  { %v2899_v3 = vpop.f32.mrb[5].mxu1 }
  0xfa   :  { %v272_v4 = vpop.f32.mrb[6].mxu1 }
  0xfb   :  { %v2900_v5 = vpop.f32.mrb[7].mxu1 }
  0xff   :  { %v3232_v29 = vpop.eup %3231 }
 0x100   :  { %v212_v30 = vadd.f32 1.0, %v3232_v29 }
 0x102   :  { %3233 = vrcp.f32 %v212_v30 }
 0x10c   :  { %v3234_v31 = vpop.eup %3233 }
 0x10d   :  { %v215_v32 = vmul.f32 2.0, %v3234_v31  ;;  %v217_v36 = vmul.f32 0.0, %v3234_v31 }
 0x10f   :  { %v2658_v33 = vadd.f32 -1.0, %v215_v32 }
 0x111   :  { %219 = vrot.lane.b32.xlu0 %v2658_v33, %s3412_s30 }
 0x183   :  { %v220_v34 = vpop.permute.xlu0 %219 }
 0x184   :  { %v222_v35 = vmul.f32 %v3234_v31, %v220_v34 }
 0x186   :  { %224 = vrot.lane.b32.xlu0 %v222_v35, %s3413_s3 }
 0x1f8   :  { %v225_v37 = vpop.permute.xlu0 %224 }
 0x1f9   :  { %v3482_v38 = vadd.f32 %v225_v37, %v217_v36 }
 0x1fb   :  { %3235 = vtanh.f32 %v3482_v38 }
 0x205   :  { %v3236_v57 = vpop.eup %3235 }
 0x206   :  { %230 = vrot.lane.b32.xlu1 %v3236_v57, %s3412_s30  ;;  %v41_v57 = vld [vmem:[#allocation2 + $0xb8] sm:$0xff] }
 0x207   :  { %v3561_v3 = vpack.c.bf16 %v41_v57, %v40_v53 }
 0x278   :  { %v231_v58 = vpop.permute.xlu1 %230 }
 0x279   :  { %v233_v59 = vmul.f32 %v3234_v31, %v231_v58  ;;  %v52_v58 = vld [vmem:[#allocation2 + $0x80] sm:$0xff] }
 0x27b   :  { %v234_v60 = vpack.c.bf16 %v233_v59, %v233_v59  ;;  %v53_v59 = vld [vmem:[#allocation2 + $0x88] sm:$0xff] }
 0x27d   :  { %276 = vrot.lane.b32.xlu1 %v234_v60, %s3413_s3  ;;  %v54_v60 = vld [vmem:[#allocation2 + $0x90] sm:$0xff] }
 0x2ef   :  { %v277_v6 = vpop.permute.xlu1 %276 }
 0x2f0   :  { %2906 = vmatmul.mubr.msk.bf16.vlgmr.msra.gmra.mrb[8].mxu0 %vm164_vm2, %v277_v6  ;;  %2914 = vmatmul.mubr.msk.bf16.vlgmr.msra.gmra.mrb[8].mxu1 %vm164_vm2, %v277_v6 }
 0x2f1   :  { %2921 = vmatprep.mubr.msk.bf16.mxu0 %vm3410_vm0, %v3409_v0  ;;  %2929 = vmatprep.mubr.msk.bf16.mxu1 %vm3410_vm0, %v3409_v0 }
 0x2f2   :  { %2918 = vmatpush3.bf16.msra.mxu0 %v3556_v54 }
 0x2f3   :  { %2919 = vmatprep.subr.bf16.mxu0 %v3409_v0 }
 0x2f6   :  { %2920 = vmatpush3.bf16.msra.mxu0 %v3561_v3 }
 0x2f7   :  { %2933 = vmatprep.subr.bf16.mxu0 %v3409_v0 }
 0x2f9   :  { %2922 = vmatmul.mubr.bf16.vlgmr.msra.gmra.mrb[12].mxu0 %v3411_v16 }
 0x2fa   :  { %2934 = vmatpush3.bf16.msra.mxu0 %v3493_v46  ;;  %2937 = vmatprep.mubr.msk.bf16.mxu0 %vm3410_vm0, %v3409_v0 }
 0x2fb   :  { %2935 = vmatprep.subr.bf16.mxu0 %v3409_v0 }
 0x2fe   :  { %2936 = vmatpush3.bf16.msra.mxu0 %v3504_v55 }
 0x2ff   :  { %2949 = vmatprep.subr.bf16.mxu0 %v3409_v0 }
 0x3c3   :  { %v315_v10 = vpop.f32.mrb[8].mxu0  ;;  %v381_v11 = vpop.f32.mrb[8].mxu1 }
 0x3c4   :  { %v316_v12 = vadd.f32 %v315_v10, %v269_v2  ;;  %v387_v13 = vadd.f32 %v381_v11, %v137_v7  ;;  %v2907_v14 = vpop.f32.mrb[9].mxu0  ;;  %v2915_v19 = vpop.f32.mrb[9].mxu1  ;;  %v55_v2 = vld [vmem:[#allocation2 + $0x98] sm:$0xff] }
 0x3c5   :  { %v318_v20 = vpop.f32.mrb[10].mxu0  ;;  %v384_v23 = vpop.f32.mrb[10].mxu1  ;;  %v3565_v4 = vpack.c.bf16 %v55_v2, %v54_v60 }
 0x3c6   :  { %v321_v24 = vadd.f32 %v3542_v9, %v316_v12  ;;  %v2663_v25 = vmul.f32 -1.442695, %v387_v13  ;;  %v2908_v26 = vpop.f32.mrb[11].mxu0  ;;  %v2916_v27 = vpop.f32.mrb[11].mxu1 }
 0x3c7   :  { %v3611_v26 = vld [vmem:[#allocation2 + $0xc0] ss:$0 sm:$0xff] }
 0x3c8   :  { %v2660_v28 = vmul.f32 -1.442695, %v321_v24  ;;  %3237 = vpow2.f32 %v2663_v25 }
 0x3ca   :  { %3239 = vpow2.f32 %v2660_v28 }
 0x3cc   :  { %v448_v16 = vpop.f32.mrb[12].mxu0 }
 0x3cd   :  { %v2923_v19 = vpop.f32.mrb[13].mxu0 }
 0x3ce   :  { %v451_v20 = vpop.f32.mrb[14].mxu0 }
 0x3cf   :  { %v2924_v23 = vpop.f32.mrb[15].mxu0 }
 0x3d2   :  { %v3238_v29 = vpop.eup %3237 }
 0x3d3   :  { %v391_v22 = vadd.f32 1.0, %v3238_v29 }
 0x3d4   :  { %v3240_v30 = vpop.eup %3239 }
 0x3d5   :  { %v325_v31 = vadd.f32 1.0, %v3240_v30  ;;  %3241 = vrcp.f32 %v391_v22 }
 0x3d7   :  { %3243 = vrcp.f32 %v325_v31 }
 0x3df   :  { %v3242_v32 = vpop.eup %3241 }
 0x3e0   :  { %v394_v33 = vmul.f32 2.0, %v3242_v32  ;;  %v396_v44 = vmul.f32 %v3242_v32, %v3482_v38  ;;  %v3558_v38 = vpack.c.bf16 %v53_v59, %v52_v58 }
 0x3e1   :  { %v3244_v34 = vpop.eup %3243 }
 0x3e2   :  { %v2664_v35 = vadd.f32 -1.0, %v394_v33  ;;  %v328_v36 = vmul.f32 2.0, %v3244_v34  ;;  %v330_v48 = vmul.f32 0.0, %v3244_v34  ;;  %2926 = vmatpush3.bf16.msra.mxu1 %v3558_v38 }
 0x3e3   :  { %2927 = vmatprep.subr.bf16.mxu1 %v3409_v0 }
 0x3e4   :  { %398 = vrot.lane.b32.xlu1 %v2664_v35, %s3412_s30  ;;  %v2661_v37 = vadd.f32 -1.0, %v328_v36 }
 0x3e6   :  { %332 = vrot.lane.b32.xlu0 %v2661_v37, %s3412_s30  ;;  %2928 = vmatpush3.bf16.msra.mxu1 %v3565_v4  ;;  %v142_v37 = vadd.f32 %v3473_v18, %v3471_v17 }
 0x3e7   :  { %2941 = vmatprep.subr.bf16.mxu1 %v3409_v0 }
 0x456   :  { %v399_v39 = vpop.permute.xlu1 %398 }
 0x457   :  { %v401_v40 = vmul.f32 %v3242_v32, %v399_v39 }
 0x458   :  { %v333_v41 = vpop.permute.xlu0 %332 }
 0x459   :  { %v335_v43 = vmul.f32 %v3244_v34, %v333_v41  ;;  %403 = vrot.lane.b32.xlu1 %v401_v40, %s3413_s3 }
 0x45b   :  { %337 = vrot.lane.b32.xlu0 %v335_v43, %s3413_s3 }
 0x4cb   :  { %v404_v45 = vpop.permute.xlu1 %403 }
 0x4cc   :  { %v3550_v47 = vadd.f32 %v404_v45, %v396_v44 }
 0x4cd   :  { %v338_v49 = vpop.permute.xlu0 %337 }
 0x4ce   :  { %3245 = vtanh.f32 %v3550_v47  ;;  %v3553_v50 = vadd.f32 %v338_v49, %v330_v48 }
 0x4d0   :  { %3247 = vtanh.f32 %v3553_v50 }
 0x4d8   :  { %v3246_v5 = vpop.eup %3245 }
 0x4d9   :  { %409 = vrot.lane.b32.xlu1 %v3246_v5, %s3412_s30 }
 0x4da   :  { %v3248_v6 = vpop.eup %3247 }
 0x4db   :  { %343 = vrot.lane.b32.xlu0 %v3248_v6, %s3412_s30 }
 0x54b   :  { %v410_v7 = vpop.permute.xlu1 %409 }
 0x54c   :  { %v412_v10 = vmul.f32 %v3242_v32, %v410_v7 }
 0x54d   :  { %v344_v11 = vpop.permute.xlu0 %343 }
 0x54e   :  { %v526_v12 = vpack.c.bf16 %v412_v10, %v412_v10  ;;  %v346_v13 = vmul.f32 %v3244_v34, %v344_v11 }
 0x550   :  { %v413_v14 = vpack.c.bf16 %v346_v13, %v346_v13  ;;  %568 = vrot.lane.b32.xlu1 %v526_v12, %s3413_s3 }
 0x552   :  { %455 = vrot.lane.b32.xlu0 %v413_v14, %s3413_s3 }
 0x5c2   :  { %v569_v25 = vpop.permute.xlu1 %568 }
 0x5c4   :  { %v456_v24 = vpop.permute.xlu0 %455 }
 0x5c5   :  { %2930 = vmatmul.mubr.msk.bf16.vlgmr.msra.gmra.mrb[12].mxu1 %vm164_vm2, %v456_v24  ;;  %2938 = vmatmul.mubr.msk.bf16.vlgmr.msra.gmra.mrb[16].mxu0 %vm164_vm2, %v456_v24 }
 0x5c6   :  { %2942 = vmatpush3.bf16.msra.mxu1 %v3485_v42  ;;  %2950 = vmatpush3.bf16.msra.mxu0 %v3451_v8 }
 0x5c7   :  { %2943 = vmatprep.subr.bf16.mxu1 %v3409_v0  ;;  %2951 = vmatprep.subr.bf16.mxu0 %v3409_v0 }
 0x5c8   :  { %2945 = vmatprep.mubr.msk.bf16.mxu1 %vm3410_vm0, %v3409_v0  ;;  %2953 = vmatprep.mubr.msk.bf16.mxu0 %vm3410_vm0, %v3409_v0 }
 0x5ca   :  { %2944 = vmatpush3.bf16.msra.mxu1 %v3506_v56  ;;  %2952 = vmatpush3.bf16.msra.mxu0 %v3460_v15 }
 0x5cb   :  { %2957 = vmatprep.subr.bf16.mxu1 %v3409_v0  ;;  %2965 = vmatprep.subr.bf16.mxu0 %v3409_v0 }
 0x5cd   :  { %2946 = vmatmul.mubr.msk.bf16.vlgmr.msra.gmra.mrb[16].mxu1 %vm164_vm2, %v569_v25  ;;  %2954 = vmatmul.mubr.msk.bf16.vlgmr.msra.gmra.mrb[20].mxu0 %vm164_vm2, %v569_v25 }
 0x5ce   :  { %2958 = vmatpush3.bf16.msra.mxu1 %v3556_v54  ;;  %2961 = vmatprep.mubr.msk.bf16.mxu1 %vm3410_vm0, %v3409_v0 }
 0x5cf   :  { %2959 = vmatprep.subr.bf16.mxu1 %v3409_v0  ;;  %2966 = vmatpush3.bf16.msra.mxu0 %v3558_v38 }
 0x5d0   :  { %2967 = vmatprep.subr.bf16.mxu0 %v3409_v0  ;;  %2969 = vmatprep.mubr.msk.bf16.mxu0 %vm3410_vm0, %v3409_v0 }
 0x5d2   :  { %2960 = vmatpush3.bf16.msra.mxu1 %v3561_v3 }
 0x5d3   :  { %2973 = vmatprep.subr.bf16.mxu1 %v3409_v0  ;;  %2968 = vmatpush3.bf16.msra.mxu0 %v3565_v4 }
 0x5d4   :  { %2981 = vmatprep.subr.bf16.mxu0 %v3409_v0 }
 0x698   :  { %v494_v27 = vpop.f32.mrb[12].mxu1  ;;  %v561_v28 = vpop.f32.mrb[16].mxu0 }
 0x699   :  { %v495_v29 = vadd.f32 %v494_v27, %v448_v16  ;;  %v2931_v22 = vpop.f32.mrb[13].mxu1  ;;  %v2939_v30 = vpop.f32.mrb[17].mxu0 }
 0x69a   :  { %v497_v31 = vpop.f32.mrb[14].mxu1  ;;  %v564_v32 = vpop.f32.mrb[18].mxu0 }
 0x69b   :  { %v500_v33 = vadd.f32 %v3611_v26, %v495_v29  ;;  %v2932_v34 = vpop.f32.mrb[15].mxu1  ;;  %v2940_v35 = vpop.f32.mrb[19].mxu0 }
 0x69d   :  { %v2666_v36 = vmul.f32 -1.442695, %v500_v33 }
 0x69f   :  { %3249 = vpow2.f32 %v2666_v36 }
 0x6a0   :  { %v607_v39 = vpop.f32.mrb[16].mxu1  ;;  %v673_v40 = vpop.f32.mrb[20].mxu0 }
 0x6a1   :  { %v608_v41 = vadd.f32 %v607_v39, %v561_v28  ;;  %v679_v43 = vadd.f32 %v673_v40, %v142_v37  ;;  %v2947_v44 = vpop.f32.mrb[17].mxu1  ;;  %v2955_v45 = vpop.f32.mrb[21].mxu0 }
 0x6a2   :  { %v610_v48 = vpop.f32.mrb[18].mxu1  ;;  %v676_v49 = vpop.f32.mrb[22].mxu0 }
 0x6a3   :  { %v613_v51 = vadd.f32 %v3542_v9, %v608_v41  ;;  %v2673_v52 = vmul.f32 -1.442695, %v679_v43  ;;  %v2948_v53 = vpop.f32.mrb[19].mxu1  ;;  %v2956_v57 = vpop.f32.mrb[23].mxu0 }
 0x6a5   :  { %v2670_v58 = vmul.f32 -1.442695, %v613_v51  ;;  %3251 = vpow2.f32 %v2673_v52 }
 0x6a7   :  { %3253 = vpow2.f32 %v2670_v58 }
 0x6a9   :  { %v3250_v59 = vpop.eup %3249 }
 0x6aa   :  { %v504_v60 = vadd.f32 1.0, %v3250_v59 }
 0x6ac   :  { %3255 = vrcp.f32 %v504_v60 }
 0x6af   :  { %v3252_v18 = vpop.eup %3251 }
 0x6b0   :  { %v683_v2 = vadd.f32 1.0, %v3252_v18 }
 0x6b1   :  { %v3254_v5 = vpop.eup %3253 }
 0x6b2   :  { %v617_v6 = vadd.f32 1.0, %v3254_v5  ;;  %3257 = vrcp.f32 %v683_v2 }
 0x6b4   :  { %3259 = vrcp.f32 %v617_v6 }
 0x6b6   :  { %v3256_v7 = vpop.eup %3255 }
 0x6b7   :  { %v507_v10 = vmul.f32 2.0, %v3256_v7  ;;  %v509_v22 = vmul.f32 0.0, %v3256_v7 }
 0x6b9   :  { %v2667_v11 = vadd.f32 -1.0, %v507_v10 }
 0x6bb   :  { %511 = vrot.lane.b32.xlu0 %v2667_v11, %s3412_s30 }
 0x6bc   :  { %v3258_v12 = vpop.eup %3257 }
 0x6bd   :  { %v686_v13 = vmul.f32 2.0, %v3258_v12  ;;  %v688_v32 = vmul.f32 %v3258_v12, %v3550_v47 }
 0x6be   :  { %v3260_v14 = vpop.eup %3259 }
 0x6bf   :  { %v2674_v16 = vadd.f32 -1.0, %v686_v13  ;;  %v620_v19 = vmul.f32 2.0, %v3260_v14  ;;  %v622_v35 = vmul.f32 %v3260_v14, %v3553_v50 }
 0x6c1   :  { %690 = vrot.lane.b32.xlu0 %v2674_v16, %s3412_s30  ;;  %v2671_v20 = vadd.f32 -1.0, %v620_v19 }
 0x6c3   :  { %624 = vrot.lane.b32.xlu1 %v2671_v20, %s3412_s30 }
 0x72d   :  { %v512_v23 = vpop.permute.xlu0 %511 }
 0x72e   :  { %v514_v24 = vmul.f32 %v3256_v7, %v512_v23  ;;  %v145_v23 = vadd.f32 %v3476_v21, %v3471_v17 }
 0x730   :  { %516 = vrot.lane.b32.xlu1 %v514_v24, %s3413_s3 }
 0x733   :  { %v691_v25 = vpop.permute.xlu0 %690 }
 0x734   :  { %v693_v27 = vmul.f32 %v3258_v12, %v691_v25 }
 0x735   :  { %v625_v28 = vpop.permute.xlu1 %624 }
 0x736   :  { %v627_v29 = vmul.f32 %v3260_v14, %v625_v28  ;;  %695 = vrot.lane.b32.xlu1 %v693_v27, %s3413_s3 }
 0x738   :  { %629 = vrot.lane.b32.xlu0 %v627_v29, %s3413_s3 }
 0x7a2   :  { %v517_v30 = vpop.permute.xlu1 %516 }
 0x7a3   :  { %v3623_v31 = vadd.f32 %v517_v30, %v509_v22 }
 0x7a5   :  { %3261 = vtanh.f32 %v3623_v31 }
 0x7a8   :  { %v696_v33 = vpop.permute.xlu1 %695 }
 0x7a9   :  { %v3627_v34 = vadd.f32 %v696_v33, %v688_v32 }
 0x7aa   :  { %v630_v36 = vpop.permute.xlu0 %629 }
 0x7ab   :  { %3263 = vtanh.f32 %v3627_v34  ;;  %v3631_v37 = vadd.f32 %v630_v36, %v622_v35 }
 0x7ad   :  { %3265 = vtanh.f32 %v3631_v37 }
 0x7af   :  { %v3262_v39 = vpop.eup %3261 }
 0x7b0   :  { %522 = vrot.lane.b32.xlu0 %v3262_v39, %s3412_s30 }
 0x7b5   :  { %v3264_v40 = vpop.eup %3263 }
 0x7b6   :  { %701 = vrot.lane.b32.xlu0 %v3264_v40, %s3412_s30 }
 0x7b7   :  { %v3266_v41 = vpop.eup %3265 }
 0x7b8   :  { %635 = vrot.lane.b32.xlu1 %v3266_v41, %s3412_s30 }
 0x822   :  { %v523_v47 = vpop.permute.xlu0 %522 }
 0x823   :  { %v525_v43 = vmul.f32 %v3256_v7, %v523_v47 }
 0x825   :  { %v706_v44 = vpack.c.bf16 %v525_v43, %v525_v43 }
 0x827   :  { %708 = vrot.lane.b32.xlu1 %v706_v44, %s3413_s3 }
 0x828   :  { %v702_v50 = vpop.permute.xlu0 %701 }
 0x829   :  { %v704_v45 = vmul.f32 %v3258_v12, %v702_v50 }
 0x82a   :  { %v636_v48 = vpop.permute.xlu1 %635 }
 0x82b   :  { %v825_v49 = vpack.c.bf16 %v704_v45, %v704_v45  ;;  %v638_v51 = vmul.f32 %v3260_v14, %v636_v48 }
 0x82d   :  { %v705_v52 = vpack.c.bf16 %v638_v51, %v638_v51  ;;  %867 = vrot.lane.b32.xlu1 %v825_v49, %s3413_s3 }
 0x82f   :  { %754 = vrot.lane.b32.xlu0 %v705_v52, %s3413_s3 }
 0x899   :  { %v709_v53 = vpop.permute.xlu1 %708 }
 0x89a   :  { %2962 = vmatmul.mubr.msk.bf16.vlgmr.msra.gmra.mrb[20].mxu1 %vm164_vm2, %v709_v53 }
 0x89b   :  { %2974 = vmatpush3.bf16.msra.mxu1 %v3493_v46  ;;  %2977 = vmatprep.mubr.msk.bf16.mxu1 %vm3410_vm0, %v3409_v0 }
 0x89c   :  { %2975 = vmatprep.subr.bf16.mxu1 %v3409_v0 }
 0x89f   :  { %2976 = vmatpush3.bf16.msra.mxu1 %v3504_v55  ;;  %v868_v58 = vpop.permute.xlu1 %867 }
 0x8a0   :  { %2989 = vmatprep.subr.bf16.mxu1 %v3409_v0 }
 0x8a1   :  { %v755_v57 = vpop.permute.xlu0 %754 }
 0x8a2   :  { %2970 = vmatmul.mubr.msk.bf16.vlgmr.msra.gmra.mrb[24].mxu0 %vm164_vm2, %v755_v57  ;;  %2978 = vmatmul.mubr.msk.bf16.vlgmr.msra.gmra.mrb[24].mxu1 %vm164_vm2, %v755_v57 }
 0x8a3   :  { %2982 = vmatpush3.bf16.msra.mxu0 %v3485_v42  ;;  %2990 = vmatpush3.bf16.msra.mxu1 %v3451_v8 }
 0x8a4   :  { %2983 = vmatprep.subr.bf16.mxu0 %v3409_v0  ;;  %2991 = vmatprep.subr.bf16.mxu1 %v3409_v0 }
 0x8a5   :  { %2985 = vmatprep.mubr.msk.bf16.mxu0 %vm3410_vm0, %v3409_v0  ;;  %2993 = vmatprep.mubr.msk.bf16.mxu1 %vm3410_vm0, %v3409_v0 }
 0x8a7   :  { %2984 = vmatpush3.bf16.msra.mxu0 %v3506_v56  ;;  %2992 = vmatpush3.bf16.msra.mxu1 %v3460_v15 }
 0x8a8   :  { %2997 = vmatprep.subr.bf16.mxu0 %v3409_v0  ;;  %3005 = vmatprep.subr.bf16.mxu1 %v3409_v0 }
 0x8aa   :  { %2986 = vmatmul.mubr.msk.bf16.vlgmr.msra.gmra.mrb[28].mxu0 %vm164_vm2, %v868_v58  ;;  %2994 = vmatmul.mubr.msk.bf16.vlgmr.msra.gmra.mrb[28].mxu1 %vm164_vm2, %v868_v58 }
 0x8ab   :  { %2998 = vmatpush3.bf16.msra.mxu0 %v3556_v54  ;;  %3001 = vmatprep.mubr.msk.bf16.mxu0 %vm3410_vm0, %v3409_v0 }
 0x8ac   :  { %2999 = vmatprep.subr.bf16.mxu0 %v3409_v0  ;;  %3006 = vmatpush3.bf16.msra.mxu1 %v3558_v38 }
 0x8ad   :  { %3007 = vmatprep.subr.bf16.mxu1 %v3409_v0  ;;  %3009 = vmatprep.mubr.msk.bf16.mxu1 %vm3410_vm0, %v3409_v0 }
 0x8af   :  { %3000 = vmatpush3.bf16.msra.mxu0 %v3561_v3 }
 0x8b0   :  { %3013 = vmatprep.subr.bf16.mxu0 %v3409_v0  ;;  %3008 = vmatpush3.bf16.msra.mxu1 %v3565_v4 }
 0x8b1   :  { %3021 = vmatprep.subr.bf16.mxu1 %v3409_v0 }
 0x96d   :  { %v747_v59 = vpop.f32.mrb[20].mxu1 }
 0x96e   :  { %v2963_v60 = vpop.f32.mrb[21].mxu1 }
 0x96f   :  { %v750_v18 = vpop.f32.mrb[22].mxu1 }
 0x970   :  { %v2964_v2 = vpop.f32.mrb[23].mxu1 }
 0x975   :  { %v793_v5 = vpop.f32.mrb[24].mxu0  ;;  %v860_v6 = vpop.f32.mrb[24].mxu1 }
 0x976   :  { %v794_v7 = vadd.f32 %v793_v5, %v747_v59  ;;  %v2971_v10 = vpop.f32.mrb[25].mxu0  ;;  %v2979_v11 = vpop.f32.mrb[25].mxu1 }
 0x977   :  { %v796_v12 = vpop.f32.mrb[26].mxu0  ;;  %v863_v13 = vpop.f32.mrb[26].mxu1 }
 0x978   :  { %v799_v14 = vadd.f32 %v3611_v26, %v794_v7  ;;  %v2972_v16 = vpop.f32.mrb[27].mxu0  ;;  %v2980_v19 = vpop.f32.mrb[27].mxu1 }
 0x97a   :  { %v2677_v20 = vmul.f32 -1.442695, %v799_v14 }
 0x97c   :  { %3267 = vpow2.f32 %v2677_v20 }
 0x97d   :  { %v906_v24 = vpop.f32.mrb[28].mxu0  ;;  %v972_v25 = vpop.f32.mrb[28].mxu1 }
 0x97e   :  { %v907_v27 = vadd.f32 %v906_v24, %v860_v6  ;;  %v978_v28 = vadd.f32 %v972_v25, %v145_v23  ;;  %v2987_v29 = vpop.f32.mrb[29].mxu0  ;;  %v2995_v22 = vpop.f32.mrb[29].mxu1 }
 0x97f   :  { %v909_v30 = vpop.f32.mrb[30].mxu0  ;;  %v975_v32 = vpop.f32.mrb[30].mxu1 }
 0x980   :  { %v912_v33 = vadd.f32 %v3542_v9, %v907_v27  ;;  %v2684_v35 = vmul.f32 -1.442695, %v978_v28  ;;  %v2988_v36 = vpop.f32.mrb[31].mxu0  ;;  %v2996_v39 = vpop.f32.mrb[31].mxu1 }
 0x982   :  { %v2681_v40 = vmul.f32 -1.442695, %v912_v33  ;;  %3269 = vpow2.f32 %v2684_v35 }
 0x984   :  { %3271 = vpow2.f32 %v2681_v40 }
 0x986   :  { %v3268_v41 = vpop.eup %3267 }
 0x987   :  { %v803_v47 = vadd.f32 1.0, %v3268_v41 }
 0x989   :  { %3273 = vrcp.f32 %v803_v47 }
 0x98c   :  { %v3270_v21 = vpop.eup %3269 }
 0x98d   :  { %v982_v43 = vadd.f32 1.0, %v3270_v21 }
 0x98e   :  { %v3272_v44 = vpop.eup %3271 }
 0x98f   :  { %v916_v50 = vadd.f32 1.0, %v3272_v44  ;;  %3275 = vrcp.f32 %v982_v43 }
 0x991   :  { %3277 = vrcp.f32 %v916_v50 }
 0x993   :  { %v3274_v45 = vpop.eup %3273 }
 0x994   :  { %v806_v48 = vmul.f32 2.0, %v3274_v45  ;;  %v808_v10 = vmul.f32 %v3274_v45, %v3623_v31 }
 0x996   :  { %v2678_v49 = vadd.f32 -1.0, %v806_v48 }
 0x998   :  { %810 = vrot.lane.b32.xlu0 %v2678_v49, %s3412_s30 }
 0x999   :  { %v3276_v51 = vpop.eup %3275 }
 0x99a   :  { %v985_v52 = vmul.f32 2.0, %v3276_v51  ;;  %v987_v13 = vmul.f32 %v3276_v51, %v3627_v34 }
 0x99b   :  { %v3278_v53 = vpop.eup %3277 }
 0x99c   :  { %v2685_v57 = vadd.f32 -1.0, %v985_v52  ;;  %v919_v58 = vmul.f32 2.0, %v3278_v53  ;;  %v921_v19 = vmul.f32 %v3278_v53, %v3631_v37 }
 0x99e   :  { %989 = vrot.lane.b32.xlu0 %v2685_v57, %s3412_s30  ;;  %v2682_v59 = vadd.f32 -1.0, %v919_v58 }
 0x9a0   :  { %923 = vrot.lane.b32.xlu1 %v2682_v59, %s3412_s30  ;;  %v150_v59 = vadd.f32 %v3471_v17, %v3528_v62 }
 0xa0a   :  { %v811_v60 = vpop.permute.xlu0 %810 }
 0xa0b   :  { %v813_v18 = vmul.f32 %v3274_v45, %v811_v60 }
 0xa0d   :  { %815 = vrot.lane.b32.xlu1 %v813_v18, %s3413_s3 }
 0xa10   :  { %v990_v2 = vpop.permute.xlu0 %989 }
 0xa11   :  { %v992_v5 = vmul.f32 %v3276_v51, %v990_v2 }
 0xa12   :  { %v924_v6 = vpop.permute.xlu1 %923 }
 0xa13   :  { %v926_v7 = vmul.f32 %v3278_v53, %v924_v6  ;;  %994 = vrot.lane.b32.xlu1 %v992_v5, %s3413_s3 }
 0xa15   :  { %928 = vrot.lane.b32.xlu0 %v926_v7, %s3413_s3 }
 0xa7f   :  { %v816_v11 = vpop.permute.xlu1 %815 }
 0xa80   :  { %v3686_v12 = vadd.f32 %v816_v11, %v808_v10 }
 0xa82   :  { %3279 = vtanh.f32 %v3686_v12 }
 0xa85   :  { %v995_v14 = vpop.permute.xlu1 %994 }
 0xa86   :  { %v3690_v16 = vadd.f32 %v995_v14, %v987_v13 }
 0xa87   :  { %v929_v20 = vpop.permute.xlu0 %928 }
 0xa88   :  { %3281 = vtanh.f32 %v3690_v16  ;;  %v3694_v23 = vadd.f32 %v929_v20, %v921_v19 }
 0xa8a   :  { %3283 = vtanh.f32 %v3694_v23 }
 0xa8c   :  { %v3280_v31 = vpop.eup %3279 }
 0xa8d   :  { %821 = vrot.lane.b32.xlu0 %v3280_v31, %s3412_s30 }
 0xa92   :  { %v3282_v24 = vpop.eup %3281 }
 0xa93   :  { %1000 = vrot.lane.b32.xlu0 %v3282_v24, %s3412_s30 }
 0xa94   :  { %v3284_v25 = vpop.eup %3283 }
 0xa95   :  { %934 = vrot.lane.b32.xlu1 %v3284_v25, %s3412_s30 }
 0xaff   :  { %v822_v34 = vpop.permute.xlu0 %821 }
 0xb00   :  { %v824_v27 = vmul.f32 %v3274_v45, %v822_v34 }
 0xb02   :  { %v1005_v28 = vpack.c.bf16 %v824_v27, %v824_v27 }
 0xb04   :  { %1007 = vrot.lane.b32.xlu1 %v1005_v28, %s3413_s3 }
 0xb05   :  { %v1001_v37 = vpop.permute.xlu0 %1000 }
 0xb06   :  { %v1003_v29 = vmul.f32 %v3276_v51, %v1001_v37 }
 0xb07   :  { %v935_v22 = vpop.permute.xlu1 %934 }
 0xb08   :  { %v1124_v30 = vpack.c.bf16 %v1003_v29, %v1003_v29  ;;  %v937_v32 = vmul.f32 %v3278_v53, %v935_v22 }
 0xb0a   :  { %v1004_v33 = vpack.c.bf16 %v937_v32, %v937_v32  ;;  %1166 = vrot.lane.b32.xlu1 %v1124_v30, %s3413_s3 }
 0xb0c   :  { %1053 = vrot.lane.b32.xlu0 %v1004_v33, %s3413_s3 }
 0xb76   :  { %v1008_v35 = vpop.permute.xlu1 %1007 }
 0xb77   :  { %3002 = vmatmul.mubr.msk.bf16.vlgmr.msra.gmra.mrb[32].mxu0 %vm164_vm2, %v1008_v35 }
 0xb78   :  { %3014 = vmatpush3.bf16.msra.mxu0 %v3493_v46  ;;  %3017 = vmatprep.mubr.msk.bf16.mxu0 %vm3410_vm0, %v3409_v0 }
 0xb79   :  { %3015 = vmatprep.subr.bf16.mxu0 %v3409_v0 }
 0xb7c   :  { %3016 = vmatpush3.bf16.msra.mxu0 %v3504_v55  ;;  %v1167_v39 = vpop.permute.xlu1 %1166 }
 0xb7d   :  { %3029 = vmatprep.subr.bf16.mxu0 %v3409_v0 }
 0xb7e   :  { %v1054_v36 = vpop.permute.xlu0 %1053 }
 0xb7f   :  { %3010 = vmatmul.mubr.msk.bf16.vlgmr.msra.gmra.mrb[32].mxu1 %vm164_vm2, %v1054_v36  ;;  %3018 = vmatmul.mubr.msk.bf16.vlgmr.msra.gmra.mrb[36].mxu0 %vm164_vm2, %v1054_v36 }
 0xb80   :  { %3022 = vmatpush3.bf16.msra.mxu1 %v3485_v42  ;;  %3030 = vmatpush3.bf16.msra.mxu0 %v3451_v8 }
 0xb81   :  { %3023 = vmatprep.subr.bf16.mxu1 %v3409_v0  ;;  %3031 = vmatprep.subr.bf16.mxu0 %v3409_v0 }
 0xb82   :  { %3025 = vmatprep.mubr.msk.bf16.mxu1 %vm3410_vm0, %v3409_v0  ;;  %3033 = vmatprep.mubr.msk.bf16.mxu0 %vm3410_vm0, %v3409_v0 }
 0xb84   :  { %3024 = vmatpush3.bf16.msra.mxu1 %v3506_v56  ;;  %3032 = vmatpush3.bf16.msra.mxu0 %v3460_v15 }
 0xb85   :  { %3037 = vmatprep.subr.bf16.mxu1 %v3409_v0  ;;  %3045 = vmatprep.subr.bf16.mxu0 %v3409_v0 }
 0xb87   :  { %3026 = vmatmul.mubr.msk.bf16.vlgmr.msra.gmra.mrb[36].mxu1 %vm164_vm2, %v1167_v39  ;;  %3034 = vmatmul.mubr.msk.bf16.vlgmr.msra.gmra.mrb[40].mxu0 %vm164_vm2, %v1167_v39 }
 0xb88   :  { %3038 = vmatpush3.bf16.msra.mxu1 %v3556_v54  ;;  %3041 = vmatprep.mubr.msk.bf16.mxu1 %vm3410_vm0, %v3409_v0 }
 0xb89   :  { %3039 = vmatprep.subr.bf16.mxu1 %v3409_v0  ;;  %3046 = vmatpush3.bf16.msra.mxu0 %v3558_v38 }
 0xb8a   :  { %3047 = vmatprep.subr.bf16.mxu0 %v3409_v0  ;;  %3049 = vmatprep.mubr.msk.bf16.mxu0 %vm3410_vm0, %v3409_v0 }
 0xb8c   :  { %3040 = vmatpush3.bf16.msra.mxu1 %v3561_v3 }
 0xb8d   :  { %3053 = vmatprep.subr.bf16.mxu1 %v3409_v0  ;;  %3048 = vmatpush3.bf16.msra.mxu0 %v3565_v4 }
 0xb8e   :  { %3061 = vmatprep.subr.bf16.mxu0 %v3409_v0 }
 0xc4a   :  { %v1046_v40 = vpop.f32.mrb[32].mxu0 }
 0xc4b   :  { %v3003_v41 = vpop.f32.mrb[33].mxu0 }
 0xc4c   :  { %v1049_v47 = vpop.f32.mrb[34].mxu0 }
 0xc4d   :  { %v3004_v21 = vpop.f32.mrb[35].mxu0 }
 0xc52   :  { %v1092_v43 = vpop.f32.mrb[32].mxu1  ;;  %v1159_v44 = vpop.f32.mrb[36].mxu0 }
 0xc53   :  { %v1093_v50 = vadd.f32 %v1092_v43, %v1046_v40  ;;  %v3011_v45 = vpop.f32.mrb[33].mxu1  ;;  %v3019_v48 = vpop.f32.mrb[37].mxu0 }
 0xc54   :  { %v1095_v49 = vpop.f32.mrb[34].mxu1  ;;  %v1162_v51 = vpop.f32.mrb[38].mxu0 }
 0xc55   :  { %v1098_v52 = vadd.f32 %v3611_v26, %v1093_v50  ;;  %v3012_v53 = vpop.f32.mrb[35].mxu1  ;;  %v3020_v57 = vpop.f32.mrb[39].mxu0 }
 0xc57   :  { %v2688_v58 = vmul.f32 -1.442695, %v1098_v52 }
 0xc59   :  { %3285 = vpow2.f32 %v2688_v58 }
 0xc5a   :  { %v1205_v60 = vpop.f32.mrb[36].mxu1  ;;  %v1271_v18 = vpop.f32.mrb[40].mxu0 }
 0xc5b   :  { %v1206_v2 = vadd.f32 %v1205_v60, %v1159_v44  ;;  %v1277_v5 = vadd.f32 %v1271_v18, %v150_v59  ;;  %v3027_v6 = vpop.f32.mrb[37].mxu1  ;;  %v3035_v7 = vpop.f32.mrb[41].mxu0 }
 0xc5c   :  { %v1208_v10 = vpop.f32.mrb[38].mxu1  ;;  %v1274_v11 = vpop.f32.mrb[42].mxu0 }
 0xc5d   :  { %v1211_v13 = vadd.f32 %v3542_v9, %v1206_v2  ;;  %v2695_v14 = vmul.f32 -1.442695, %v1277_v5  ;;  %v3028_v19 = vpop.f32.mrb[39].mxu1  ;;  %v3036_v20 = vpop.f32.mrb[43].mxu0 }
 0xc5f   :  { %v2692_v31 = vmul.f32 -1.442695, %v1211_v13  ;;  %3287 = vpow2.f32 %v2695_v14 }
 0xc61   :  { %3289 = vpow2.f32 %v2692_v31 }
 0xc63   :  { %v3286_v24 = vpop.eup %3285 }
 0xc64   :  { %v1102_v25 = vadd.f32 1.0, %v3286_v24 }
 0xc66   :  { %3291 = vrcp.f32 %v1102_v25 }
 0xc69   :  { %v3288_v17 = vpop.eup %3287 }
 0xc6a   :  { %v1281_v62 = vadd.f32 1.0, %v3288_v17 }
 0xc6b   :  { %v3290_v34 = vpop.eup %3289 }
 0xc6c   :  { %v1215_v27 = vadd.f32 1.0, %v3290_v34  ;;  %3293 = vrcp.f32 %v1281_v62 }
 0xc6e   :  { %3295 = vrcp.f32 %v1215_v27 }
 0xc70   :  { %v3292_v28 = vpop.eup %3291 }
 0xc71   :  { %v1105_v37 = vmul.f32 2.0, %v3292_v28  ;;  %v1107_v44 = vmul.f32 %v3292_v28, %v3686_v12 }
 0xc73   :  { %v2689_v29 = vadd.f32 -1.0, %v1105_v37 }
 0xc75   :  { %1109 = vrot.lane.b32.xlu0 %v2689_v29, %s3412_s30 }
 0xc76   :  { %v3294_v22 = vpop.eup %3293 }
 0xc77   :  { %v1284_v30 = vmul.f32 2.0, %v3294_v22  ;;  %v1286_v48 = vmul.f32 %v3294_v22, %v3690_v16 }
 0xc78   :  { %v3296_v32 = vpop.eup %3295 }
 0xc79   :  { %v2696_v33 = vadd.f32 -1.0, %v1284_v30  ;;  %v1218_v35 = vmul.f32 2.0, %v3296_v32  ;;  %v1220_v52 = vmul.f32 %v3296_v32, %v3694_v23 }
 0xc7b   :  { %1288 = vrot.lane.b32.xlu0 %v2696_v33, %s3412_s30  ;;  %v2693_v36 = vadd.f32 -1.0, %v1218_v35  ;;  %v3802_v33 = vld [vmem:[#allocation2 + $0x30] ss:$0 sm:$0xff] }
 0xc7c   :  { %v153_v35 = vadd.f32 %v3802_v33, %v3532_v1 }
 0xc7d   :  { %1222 = vrot.lane.b32.xlu1 %v2693_v36, %s3412_s30 }
 0xce7   :  { %v1110_v39 = vpop.permute.xlu0 %1109 }
 0xce8   :  { %v1112_v40 = vmul.f32 %v3292_v28, %v1110_v39 }
 0xcea   :  { %1114 = vrot.lane.b32.xlu1 %v1112_v40, %s3413_s3 }
 0xced   :  { %v1289_v41 = vpop.permute.xlu0 %1288 }
 0xcee   :  { %v1291_v47 = vmul.f32 %v3294_v22, %v1289_v41 }
 0xcef   :  { %v1223_v21 = vpop.permute.xlu1 %1222 }
 0xcf0   :  { %v1225_v43 = vmul.f32 %v3296_v32, %v1223_v21  ;;  %1293 = vrot.lane.b32.xlu1 %v1291_v47, %s3413_s3 }
 0xcf2   :  { %1227 = vrot.lane.b32.xlu0 %v1225_v43, %s3413_s3 }
 0xd5c   :  { %v1115_v50 = vpop.permute.xlu1 %1114 }
 0xd5d   :  { %v3749_v45 = vadd.f32 %v1115_v50, %v1107_v44 }
 0xd5f   :  { %3297 = vtanh.f32 %v3749_v45 }
 0xd62   :  { %v1294_v49 = vpop.permute.xlu1 %1293 }
 0xd63   :  { %v3753_v51 = vadd.f32 %v1294_v49, %v1286_v48 }
 0xd64   :  { %v1228_v53 = vpop.permute.xlu0 %1227 }
 0xd65   :  { %3299 = vtanh.f32 %v3753_v51  ;;  %v3757_v57 = vadd.f32 %v1228_v53, %v1220_v52 }
 0xd67   :  { %3301 = vtanh.f32 %v3757_v57 }
 0xd69   :  { %v3298_v12 = vpop.eup %3297 }
 0xd6a   :  { %1120 = vrot.lane.b32.xlu0 %v3298_v12, %s3412_s30 }
 0xd6f   :  { %v3300_v58 = vpop.eup %3299 }
 0xd70   :  { %1299 = vrot.lane.b32.xlu0 %v3300_v58, %s3412_s30 }
 0xd71   :  { %v3302_v59 = vpop.eup %3301 }
 0xd72   :  { %1233 = vrot.lane.b32.xlu1 %v3302_v59, %s3412_s30 }
 0xddc   :  { %v1121_v16 = vpop.permute.xlu0 %1120 }
 0xddd   :  { %v1123_v60 = vmul.f32 %v3292_v28, %v1121_v16 }
 0xddf   :  { %v1304_v18 = vpack.c.bf16 %v1123_v60, %v1123_v60 }
 0xde1   :  { %1306 = vrot.lane.b32.xlu1 %v1304_v18, %s3413_s3 }
 0xde2   :  { %v1300_v23 = vpop.permute.xlu0 %1299 }
 0xde3   :  { %v1302_v2 = vmul.f32 %v3294_v22, %v1300_v23 }
 0xde4   :  { %v1234_v5 = vpop.permute.xlu1 %1233 }
 0xde5   :  { %v1423_v6 = vpack.c.bf16 %v1302_v2, %v1302_v2  ;;  %v1236_v7 = vmul.f32 %v3296_v32, %v1234_v5 }
 0xde7   :  { %v1303_v10 = vpack.c.bf16 %v1236_v7, %v1236_v7  ;;  %1465 = vrot.lane.b32.xlu1 %v1423_v6, %s3413_s3 }
 0xde9   :  { %1352 = vrot.lane.b32.xlu0 %v1303_v10, %s3413_s3 }
 0xe53   :  { %v1307_v11 = vpop.permute.xlu1 %1306 }
 0xe54   :  { %3042 = vmatmul.mubr.msk.bf16.vlgmr.msra.gmra.mrb[40].mxu1 %vm164_vm2, %v1307_v11 }
 0xe55   :  { %3054 = vmatpush3.bf16.msra.mxu1 %v3493_v46  ;;  %3057 = vmatprep.mubr.msk.bf16.mxu1 %vm3410_vm0, %v3409_v0 }
 0xe56   :  { %3055 = vmatprep.subr.bf16.mxu1 %v3409_v0 }
 0xe59   :  { %3056 = vmatpush3.bf16.msra.mxu1 %v3504_v55  ;;  %v1466_v14 = vpop.permute.xlu1 %1465 }
 0xe5a   :  { %3069 = vmatprep.subr.bf16.mxu1 %v3409_v0 }
 0xe5b   :  { %v1353_v13 = vpop.permute.xlu0 %1352 }
 0xe5c   :  { %3050 = vmatmul.mubr.msk.bf16.vlgmr.msra.gmra.mrb[44].mxu0 %vm164_vm2, %v1353_v13  ;;  %3058 = vmatmul.mubr.msk.bf16.vlgmr.msra.gmra.mrb[44].mxu1 %vm164_vm2, %v1353_v13 }
 0xe5d   :  { %3062 = vmatpush3.bf16.msra.mxu0 %v3485_v42  ;;  %3070 = vmatpush3.bf16.msra.mxu1 %v3451_v8 }
 0xe5e   :  { %3063 = vmatprep.subr.bf16.mxu0 %v3409_v0  ;;  %3071 = vmatprep.subr.bf16.mxu1 %v3409_v0 }
 0xe5f   :  { %3065 = vmatprep.mubr.msk.bf16.mxu0 %vm3410_vm0, %v3409_v0  ;;  %3073 = vmatprep.mubr.msk.bf16.mxu1 %vm3410_vm0, %v3409_v0 }
 0xe61   :  { %3064 = vmatpush3.bf16.msra.mxu0 %v3506_v56  ;;  %3072 = vmatpush3.bf16.msra.mxu1 %v3460_v15 }
 0xe62   :  { %3077 = vmatprep.subr.bf16.mxu0 %v3409_v0  ;;  %3085 = vmatprep.subr.bf16.mxu1 %v3409_v0 }
 0xe64   :  { %3066 = vmatmul.mubr.msk.bf16.vlgmr.msra.gmra.mrb[48].mxu0 %vm164_vm2, %v1466_v14  ;;  %3074 = vmatmul.mubr.msk.bf16.vlgmr.msra.gmra.mrb[48].mxu1 %vm164_vm2, %v1466_v14 }
 0xe65   :  { %3078 = vmatpush3.bf16.msra.mxu0 %v3556_v54  ;;  %3081 = vmatprep.mubr.msk.bf16.mxu0 %vm3410_vm0, %v3409_v0 }
 0xe66   :  { %3079 = vmatprep.subr.bf16.mxu0 %v3409_v0  ;;  %3086 = vmatpush3.bf16.msra.mxu1 %v3558_v38 }
 0xe67   :  { %3087 = vmatprep.subr.bf16.mxu1 %v3409_v0  ;;  %3089 = vmatprep.mubr.msk.bf16.mxu1 %vm3410_vm0, %v3409_v0 }
 0xe69   :  { %3080 = vmatpush3.bf16.msra.mxu0 %v3561_v3 }
 0xe6a   :  { %3093 = vmatprep.subr.bf16.mxu0 %v3409_v0  ;;  %3088 = vmatpush3.bf16.msra.mxu1 %v3565_v4 }
 0xe6b   :  { %3101 = vmatprep.subr.bf16.mxu1 %v3409_v0 }
 0xf27   :  { %v1345_v19 = vpop.f32.mrb[40].mxu1 }
 0xf28   :  { %v3043_v20 = vpop.f32.mrb[41].mxu1 }
 0xf29   :  { %v1348_v31 = vpop.f32.mrb[42].mxu1 }
 0xf2a   :  { %v3044_v24 = vpop.f32.mrb[43].mxu1 }
 0xf2f   :  { %v1391_v25 = vpop.f32.mrb[44].mxu0  ;;  %v1458_v17 = vpop.f32.mrb[44].mxu1 }
 0xf30   :  { %v1392_v62 = vadd.f32 %v1391_v25, %v1345_v19  ;;  %v3051_v34 = vpop.f32.mrb[45].mxu0  ;;  %v3059_v27 = vpop.f32.mrb[45].mxu1 }
 0xf31   :  { %v1394_v28 = vpop.f32.mrb[46].mxu0  ;;  %v1461_v37 = vpop.f32.mrb[46].mxu1 }
 0xf32   :  { %v1397_v29 = vadd.f32 %v3611_v26, %v1392_v62  ;;  %v3052_v22 = vpop.f32.mrb[47].mxu0  ;;  %v3060_v30 = vpop.f32.mrb[47].mxu1 }
 0xf34   :  { %v2699_v32 = vmul.f32 -1.442695, %v1397_v29 }
 0xf36   :  { %3303 = vpow2.f32 %v2699_v32 }
 0xf37   :  { %v1504_v36 = vpop.f32.mrb[48].mxu0  ;;  %v1570_v39 = vpop.f32.mrb[48].mxu1 }
 0xf38   :  { %v1505_v40 = vadd.f32 %v1504_v36, %v1458_v17  ;;  %v1576_v41 = vadd.f32 %v1570_v39, %v153_v35  ;;  %v3067_v47 = vpop.f32.mrb[49].mxu0  ;;  %v3075_v21 = vpop.f32.mrb[49].mxu1 }
 0xf39   :  { %v1507_v43 = vpop.f32.mrb[50].mxu0  ;;  %v1573_v44 = vpop.f32.mrb[50].mxu1 }
 0xf3a   :  { %v1510_v50 = vadd.f32 %v3542_v9, %v1505_v40  ;;  %v2706_v48 = vmul.f32 -1.442695, %v1576_v41  ;;  %v3068_v49 = vpop.f32.mrb[51].mxu0  ;;  %v3076_v52 = vpop.f32.mrb[51].mxu1 }
 0xf3c   :  { %v2703_v53 = vmul.f32 -1.442695, %v1510_v50  ;;  %3305 = vpow2.f32 %v2706_v48 }
 0xf3e   :  { %3307 = vpow2.f32 %v2703_v53 }
 0xf40   :  { %v3304_v12 = vpop.eup %3303 }
 0xf41   :  { %v1401_v58 = vadd.f32 1.0, %v3304_v12 }
 0xf43   :  { %3309 = vrcp.f32 %v1401_v58 }
 0xf46   :  { %v3306_v1 = vpop.eup %3305 }
 0xf47   :  { %v1580_v59 = vadd.f32 1.0, %v3306_v1 }
 0xf48   :  { %v3308_v16 = vpop.eup %3307 }
 0xf49   :  { %v1514_v60 = vadd.f32 1.0, %v3308_v16  ;;  %3311 = vrcp.f32 %v1580_v59 }
 0xf4b   :  { %3313 = vrcp.f32 %v1514_v60 }
 0xf4d   :  { %v3310_v18 = vpop.eup %3309 }
 0xf4e   :  { %v1404_v23 = vmul.f32 2.0, %v3310_v18  ;;  %v1406_v25 = vmul.f32 %v3310_v18, %v3749_v45 }
 0xf50   :  { %v2700_v2 = vadd.f32 -1.0, %v1404_v23 }
 0xf52   :  { %1408 = vrot.lane.b32.xlu0 %v2700_v2, %s3412_s30 }
 0xf53   :  { %v3312_v9 = vpop.eup %3311 }
 0xf54   :  { %v1583_v5 = vmul.f32 2.0, %v3312_v9  ;;  %v1585_v34 = vmul.f32 %v3312_v9, %v3753_v51 }
 0xf55   :  { %v3314_v6 = vpop.eup %3313 }
 0xf56   :  { %v2707_v7 = vadd.f32 -1.0, %v1583_v5  ;;  %v1517_v10 = vmul.f32 2.0, %v3314_v6  ;;  %v1519_v37 = vmul.f32 %v3314_v6, %v3757_v57 }
 0xf58   :  { %1587 = vrot.lane.b32.xlu0 %v2707_v7, %s3412_s30  ;;  %v2704_v11 = vadd.f32 -1.0, %v1517_v10 }
 0xf5a   :  { %1521 = vrot.lane.b32.xlu1 %v2704_v11, %s3412_s30 }
 0xfc4   :  { %v1409_v13 = vpop.permute.xlu0 %1408 }
 0xfc5   :  { %v1411_v14 = vmul.f32 %v3310_v18, %v1409_v13 }
 0xfc7   :  { %1413 = vrot.lane.b32.xlu1 %v1411_v14, %s3413_s3 }
 0xfca   :  { %v1588_v19 = vpop.permute.xlu0 %1587 }
 0xfcb   :  { %v1590_v20 = vmul.f32 %v3312_v9, %v1588_v19 }
 0xfcc   :  { %v1522_v31 = vpop.permute.xlu1 %1521 }
 0xfcd   :  { %v1524_v24 = vmul.f32 %v3314_v6, %v1522_v31  ;;  %1592 = vrot.lane.b32.xlu1 %v1590_v20, %s3413_s3 }
 0xfcf   :  { %1526 = vrot.lane.b32.xlu0 %v1524_v24, %s3413_s3  ;;  %v3869_v24 = vld [vmem:[#allocation2 + $0x78] ss:$0 sm:$0xff] }
0x1039   :  { %v1414_v17 = vpop.permute.xlu1 %1413 }
0x103a   :  { %v3814_v62 = vadd.f32 %v1414_v17, %v1406_v25 }
0x103c   :  { %3315 = vtanh.f32 %v3814_v62 }
0x103f   :  { %v1593_v27 = vpop.permute.xlu1 %1592 }
0x1040   :  { %v3818_v28 = vadd.f32 %v1593_v27, %v1585_v34 }
0x1041   :  { %v1527_v29 = vpop.permute.xlu0 %1526 }
0x1042   :  { %3317 = vtanh.f32 %v3818_v28  ;;  %v3822_v22 = vadd.f32 %v1527_v29, %v1519_v37 }
0x1044   :  { %3319 = vtanh.f32 %v3822_v22 }
0x1046   :  { %v3316_v45 = vpop.eup %3315 }
0x1047   :  { %1419 = vrot.lane.b32.xlu0 %v3316_v45, %s3412_s30 }
0x104c   :  { %v3318_v30 = vpop.eup %3317 }
0x104d   :  { %1598 = vrot.lane.b32.xlu0 %v3318_v30, %s3412_s30 }
0x104e   :  { %v3320_v32 = vpop.eup %3319 }
0x104f   :  { %1532 = vrot.lane.b32.xlu1 %v3320_v32, %s3412_s30 }
0x10b9   :  { %v1420_v51 = vpop.permute.xlu0 %1419 }
0x10ba   :  { %v1422_v35 = vmul.f32 %v3310_v18, %v1420_v51 }
0x10bc   :  { %v1603_v36 = vpack.c.bf16 %v1422_v35, %v1422_v35 }
0x10be   :  { %1605 = vrot.lane.b32.xlu1 %v1603_v36, %s3413_s3 }
0x10bf   :  { %v1599_v57 = vpop.permute.xlu0 %1598 }
0x10c0   :  { %v1601_v39 = vmul.f32 %v3312_v9, %v1599_v57 }
0x10c1   :  { %v1533_v40 = vpop.permute.xlu1 %1532 }
0x10c2   :  { %v1722_v41 = vpack.c.bf16 %v1601_v39, %v1601_v39  ;;  %v1535_v47 = vmul.f32 %v3314_v6, %v1533_v40  ;;  %v158_v6 = vadd.f32 %v3802_v33, %v3526_v61 }
0x10c4   :  { %v1602_v21 = vpack.c.bf16 %v1535_v47, %v1535_v47  ;;  %1764 = vrot.lane.b32.xlu1 %v1722_v41, %s3413_s3 }
0x10c6   :  { %1651 = vrot.lane.b32.xlu0 %v1602_v21, %s3413_s3 }
0x1130   :  { %v1606_v43 = vpop.permute.xlu1 %1605 }
0x1131   :  { %3082 = vmatmul.mubr.msk.bf16.vlgmr.msra.gmra.mrb[52].mxu0 %vm164_vm2, %v1606_v43 }
0x1132   :  { %3094 = vmatpush3.bf16.msra.mxu0 %v3493_v46  ;;  %3097 = vmatprep.mubr.msk.bf16.mxu0 %vm3410_vm0, %v3409_v0 }
0x1133   :  { %3095 = vmatprep.subr.bf16.mxu0 %v3409_v0 }
0x1136   :  { %3096 = vmatpush3.bf16.msra.mxu0 %v3504_v55  ;;  %v1765_v50 = vpop.permute.xlu1 %1764 }
0x1137   :  { %3109 = vmatprep.subr.bf16.mxu0 %v3409_v0 }
0x1138   :  { %v1652_v44 = vpop.permute.xlu0 %1651 }
0x1139   :  { %3090 = vmatmul.mubr.msk.bf16.vlgmr.msra.gmra.mrb[52].mxu1 %vm164_vm2, %v1652_v44  ;;  %3098 = vmatmul.mubr.msk.bf16.vlgmr.msra.gmra.mrb[56].mxu0 %vm164_vm2, %v1652_v44 }
0x113a   :  { %3102 = vmatpush3.bf16.msra.mxu1 %v3485_v42  ;;  %3110 = vmatpush3.bf16.msra.mxu0 %v3451_v8 }
0x113b   :  { %3103 = vmatprep.subr.bf16.mxu1 %v3409_v0  ;;  %3111 = vmatprep.subr.bf16.mxu0 %v3409_v0 }
0x113c   :  { %3105 = vmatprep.mubr.msk.bf16.mxu1 %vm3410_vm0, %v3409_v0  ;;  %3113 = vmatprep.mubr.msk.bf16.mxu0 %vm3410_vm0, %v3409_v0 }
0x113e   :  { %3104 = vmatpush3.bf16.msra.mxu1 %v3506_v56  ;;  %3112 = vmatpush3.bf16.msra.mxu0 %v3460_v15 }
0x113f   :  { %3117 = vmatprep.subr.bf16.mxu1 %v3409_v0  ;;  %3125 = vmatprep.subr.bf16.mxu0 %v3409_v0 }
0x1141   :  { %3106 = vmatmul.mubr.msk.bf16.vlgmr.msra.gmra.mrb[56].mxu1 %vm164_vm2, %v1765_v50  ;;  %3114 = vmatmul.mubr.msk.bf16.vlgmr.msra.gmra.mrb[60].mxu0 %vm164_vm2, %v1765_v50 }
0x1142   :  { %3118 = vmatpush3.bf16.msra.mxu1 %v3556_v54  ;;  %3121 = vmatprep.mubr.msk.bf16.mxu1 %vm3410_vm0, %v3409_v0 }
0x1143   :  { %3119 = vmatprep.subr.bf16.mxu1 %v3409_v0  ;;  %3126 = vmatpush3.bf16.msra.mxu0 %v3558_v38 }
0x1144   :  { %3127 = vmatprep.subr.bf16.mxu0 %v3409_v0  ;;  %3129 = vmatprep.mubr.msk.bf16.mxu0 %vm3410_vm0, %v3409_v0 }
0x1146   :  { %3120 = vmatpush3.bf16.msra.mxu1 %v3561_v3 }
0x1147   :  { %3133 = vmatprep.subr.bf16.mxu1 %v3409_v0  ;;  %3128 = vmatpush3.bf16.msra.mxu0 %v3565_v4 }
0x1148   :  { %3141 = vmatprep.subr.bf16.mxu0 %v3409_v0 }
0x1204   :  { %v1644_v48 = vpop.f32.mrb[52].mxu0 }
0x1205   :  { %v3083_v49 = vpop.f32.mrb[53].mxu0 }
0x1206   :  { %v1647_v52 = vpop.f32.mrb[54].mxu0 }
0x1207   :  { %v3084_v53 = vpop.f32.mrb[55].mxu0 }
0x120c   :  { %v1690_v12 = vpop.f32.mrb[52].mxu1  ;;  %v1757_v58 = vpop.f32.mrb[56].mxu0 }
0x120d   :  { %v1691_v1 = vadd.f32 %v1690_v12, %v1644_v48  ;;  %v3091_v59 = vpop.f32.mrb[53].mxu1  ;;  %v3099_v16 = vpop.f32.mrb[57].mxu0 }
0x120e   :  { %v1693_v60 = vpop.f32.mrb[54].mxu1  ;;  %v1760_v18 = vpop.f32.mrb[58].mxu0 }
0x120f   :  { %v1696_v23 = vadd.f32 %v3611_v26, %v1691_v1  ;;  %v3092_v2 = vpop.f32.mrb[55].mxu1  ;;  %v3100_v9 = vpop.f32.mrb[59].mxu0 }
0x1211   :  { %v2710_v5 = vmul.f32 -1.442695, %v1696_v23 }
0x1213   :  { %3321 = vpow2.f32 %v2710_v5 }
0x1214   :  { %v1803_v7 = vpop.f32.mrb[56].mxu1  ;;  %v1869_v10 = vpop.f32.mrb[60].mxu0 }
0x1215   :  { %v1804_v11 = vadd.f32 %v1803_v7, %v1757_v58  ;;  %v1875_v13 = vadd.f32 %v1869_v10, %v158_v6  ;;  %v3107_v14 = vpop.f32.mrb[57].mxu1  ;;  %v3115_v19 = vpop.f32.mrb[61].mxu0 }
0x1216   :  { %v1806_v20 = vpop.f32.mrb[58].mxu1  ;;  %v1872_v31 = vpop.f32.mrb[62].mxu0 }
0x1217   :  { %v1809_v25 = vadd.f32 %v3869_v24, %v1804_v11  ;;  %v2717_v26 = vmul.f32 -1.442695, %v1875_v13  ;;  %v3108_v17 = vpop.f32.mrb[59].mxu1  ;;  %v3116_v34 = vpop.f32.mrb[63].mxu0 }
0x1219   :  { %v2714_v27 = vmul.f32 -1.442695, %v1809_v25  ;;  %3323 = vpow2.f32 %v2717_v26 }
0x121b   :  { %3325 = vpow2.f32 %v2714_v27 }
0x121d   :  { %v3322_v61 = vpop.eup %3321 }
0x121e   :  { %v1700_v37 = vadd.f32 1.0, %v3322_v61 }
0x1220   :  { %3327 = vrcp.f32 %v1700_v37 }
0x1223   :  { %v3324_v29 = vpop.eup %3323 }
0x1224   :  { %v1879_v45 = vadd.f32 1.0, %v3324_v29 }
0x1225   :  { %v3326_v30 = vpop.eup %3325 }
0x1226   :  { %v1813_v32 = vadd.f32 1.0, %v3326_v30  ;;  %3329 = vrcp.f32 %v1879_v45  ;;  %v3931_v30 = vld [vmem:[#allocation2 + $0xc0] ss:$0 sm:$0xff] }
0x1228   :  { %3331 = vrcp.f32 %v1813_v32 }
0x122a   :  { %v3328_v51 = vpop.eup %3327 }
0x122b   :  { %v1703_v35 = vmul.f32 2.0, %v3328_v51  ;;  %v1705_v53 = vmul.f32 %v3328_v51, %v3814_v62 }
0x122d   :  { %v2711_v36 = vadd.f32 -1.0, %v1703_v35 }
0x122f   :  { %1707 = vrot.lane.b32.xlu0 %v2711_v36, %s3412_s30 }
0x1230   :  { %v3330_v57 = vpop.eup %3329 }
0x1231   :  { %v1882_v39 = vmul.f32 2.0, %v3330_v57  ;;  %v1884_v1 = vmul.f32 %v3330_v57, %v3818_v28 }
0x1232   :  { %v3332_v40 = vpop.eup %3331 }
0x1233   :  { %v2718_v41 = vadd.f32 -1.0, %v1882_v39  ;;  %v1816_v47 = vmul.f32 2.0, %v3332_v40  ;;  %v1818_v60 = vmul.f32 %v3332_v40, %v3822_v22 }
0x1235   :  { %1886 = vrot.lane.b32.xlu0 %v2718_v41, %s3412_s30  ;;  %v2715_v21 = vadd.f32 -1.0, %v1816_v47 }
0x1237   :  { %1820 = vrot.lane.b32.xlu1 %v2715_v21, %s3412_s30 }
0x12a1   :  { %v1708_v43 = vpop.permute.xlu0 %1707 }
0x12a2   :  { %v1710_v44 = vmul.f32 %v3328_v51, %v1708_v43 }
0x12a4   :  { %1712 = vrot.lane.b32.xlu1 %v1710_v44, %s3413_s3 }
0x12a7   :  { %v1887_v50 = vpop.permute.xlu0 %1886 }
0x12a8   :  { %v1889_v48 = vmul.f32 %v3330_v57, %v1887_v50 }
0x12a9   :  { %v1821_v49 = vpop.permute.xlu1 %1820 }
0x12aa   :  { %v1823_v52 = vmul.f32 %v3332_v40, %v1821_v49  ;;  %1891 = vrot.lane.b32.xlu1 %v1889_v48, %s3413_s3 }
0x12ac   :  { %1825 = vrot.lane.b32.xlu0 %v1823_v52, %s3413_s3 }
0x1316   :  { %v1713_v12 = vpop.permute.xlu1 %1712 }
0x1317   :  { %v3879_v58 = vadd.f32 %v1713_v12, %v1705_v53 }
0x1319   :  { %3333 = vtanh.f32 %v3879_v58 }
0x131c   :  { %v1892_v59 = vpop.permute.xlu1 %1891 }
0x131d   :  { %v3883_v16 = vadd.f32 %v1892_v59, %v1884_v1 }
0x131e   :  { %v1826_v18 = vpop.permute.xlu0 %1825 }
0x131f   :  { %3335 = vtanh.f32 %v3883_v16  ;;  %v3887_v23 = vadd.f32 %v1826_v18, %v1818_v60 }
0x1321   :  { %3337 = vtanh.f32 %v3887_v23 }
0x1323   :  { %v3334_v62 = vpop.eup %3333 }
0x1324   :  { %1718 = vrot.lane.b32.xlu0 %v3334_v62, %s3412_s30 }
0x1329   :  { %v3336_v2 = vpop.eup %3335 }
0x132a   :  { %1897 = vrot.lane.b32.xlu0 %v3336_v2, %s3412_s30 }
0x132b   :  { %v3338_v9 = vpop.eup %3337 }
0x132c   :  { %1831 = vrot.lane.b32.xlu1 %v3338_v9, %s3412_s30 }
0x1396   :  { %v1719_v28 = vpop.permute.xlu0 %1718 }
0x1397   :  { %v1721_v5 = vmul.f32 %v3328_v51, %v1719_v28 }
0x1399   :  { %v1902_v6 = vpack.c.bf16 %v1721_v5, %v1721_v5 }
0x139b   :  { %1904 = vrot.lane.b32.xlu1 %v1902_v6, %s3413_s3 }
0x139c   :  { %v1898_v22 = vpop.permute.xlu0 %1897 }
0x139d   :  { %v1900_v7 = vmul.f32 %v3330_v57, %v1898_v22  ;;  %v161_v57 = vadd.f32 %v3802_v33, %v3530_v63 }
0x139e   :  { %v1832_v10 = vpop.permute.xlu1 %1831 }
0x139f   :  { %v2021_v11 = vpack.c.bf16 %v1900_v7, %v1900_v7  ;;  %v1834_v13 = vmul.f32 %v3332_v40, %v1832_v10 }
0x13a1   :  { %v1901_v14 = vpack.c.bf16 %v1834_v13, %v1834_v13  ;;  %2063 = vrot.lane.b32.xlu1 %v2021_v11, %s3413_s3 }
0x13a3   :  { %1950 = vrot.lane.b32.xlu0 %v1901_v14, %s3413_s3 }
0x140d   :  { %v1905_v19 = vpop.permute.xlu1 %1904 }
0x140e   :  { %3122 = vmatmul.mubr.msk.bf16.vlgmr.msra.gmra.mrb[60].mxu1 %vm164_vm2, %v1905_v19 }
0x140f   :  { %3134 = vmatpush3.bf16.msra.mxu1 %v3493_v46  ;;  %3137 = vmatprep.mubr.msk.bf16.mxu1 %vm3410_vm0, %v3409_v0 }
0x1410   :  { %3135 = vmatprep.subr.bf16.mxu1 %v3409_v0 }
0x1413   :  { %3136 = vmatpush3.bf16.msra.mxu1 %v3504_v55  ;;  %v2064_v31 = vpop.permute.xlu1 %2063 }
0x1414   :  { %3149 = vmatprep.subr.bf16.mxu1 %v3409_v0 }
0x1415   :  { %v1951_v20 = vpop.permute.xlu0 %1950 }
0x1416   :  { %3130 = vmatmul.mubr.msk.bf16.vlgmr.msra.gmra.mrb[64].mxu0 %vm164_vm2, %v1951_v20  ;;  %3138 = vmatmul.mubr.msk.bf16.vlgmr.msra.gmra.mrb[64].mxu1 %vm164_vm2, %v1951_v20 }
0x1417   :  { %3142 = vmatpush3.bf16.msra.mxu0 %v3485_v42  ;;  %3150 = vmatpush3.bf16.msra.mxu1 %v3451_v8 }
0x1418   :  { %3143 = vmatprep.subr.bf16.mxu0 %v3409_v0  ;;  %3151 = vmatprep.subr.bf16.mxu1 %v3409_v0 }
0x1419   :  { %3145 = vmatprep.mubr.msk.bf16.mxu0 %vm3410_vm0, %v3409_v0  ;;  %3153 = vmatprep.mubr.msk.bf16.mxu1 %vm3410_vm0, %v3409_v0 }
0x141b   :  { %3144 = vmatpush3.bf16.msra.mxu0 %v3506_v56  ;;  %3152 = vmatpush3.bf16.msra.mxu1 %v3460_v15 }
0x141c   :  { %3157 = vmatprep.subr.bf16.mxu0 %v3409_v0  ;;  %3165 = vmatprep.subr.bf16.mxu1 %v3409_v0 }
0x141e   :  { %3146 = vmatmul.mubr.msk.bf16.vlgmr.msra.gmra.mrb[68].mxu0 %vm164_vm2, %v2064_v31  ;;  %3154 = vmatmul.mubr.msk.bf16.vlgmr.msra.gmra.mrb[68].mxu1 %vm164_vm2, %v2064_v31 }
0x141f   :  { %3158 = vmatpush3.bf16.msra.mxu0 %v3556_v54  ;;  %3161 = vmatprep.mubr.msk.bf16.mxu0 %vm3410_vm0, %v3409_v0 }
0x1420   :  { %3159 = vmatprep.subr.bf16.mxu0 %v3409_v0  ;;  %3166 = vmatpush3.bf16.msra.mxu1 %v3558_v38 }
0x1421   :  { %3167 = vmatprep.subr.bf16.mxu1 %v3409_v0  ;;  %3169 = vmatprep.mubr.msk.bf16.mxu1 %vm3410_vm0, %v3409_v0 }
0x1423   :  { %3160 = vmatpush3.bf16.msra.mxu0 %v3561_v3 }
0x1424   :  { %3173 = vmatprep.subr.bf16.mxu0 %v3409_v0  ;;  %3168 = vmatpush3.bf16.msra.mxu1 %v3565_v4 }
0x1425   :  { %3181 = vmatprep.subr.bf16.mxu1 %v3409_v0 }
0x14e1   :  { %v1943_v8 = vpop.f32.mrb[60].mxu1 }
0x14e2   :  { %v3123_v15 = vpop.f32.mrb[61].mxu1 }
0x14e3   :  { %v1946_v25 = vpop.f32.mrb[62].mxu1 }
0x14e4   :  { %v3124_v26 = vpop.f32.mrb[63].mxu1 }
0x14e9   :  { %v1989_v17 = vpop.f32.mrb[64].mxu0  ;;  %v2056_v34 = vpop.f32.mrb[64].mxu1 }
0x14ea   :  { %v1990_v27 = vadd.f32 %v1989_v17, %v1943_v8  ;;  %v3131_v61 = vpop.f32.mrb[65].mxu0  ;;  %v3139_v37 = vpop.f32.mrb[65].mxu1 }
0x14eb   :  { %v1992_v29 = vpop.f32.mrb[66].mxu0  ;;  %v2059_v45 = vpop.f32.mrb[66].mxu1 }
0x14ec   :  { %v1995_v32 = vadd.f32 %v3931_v30, %v1990_v27  ;;  %v3132_v51 = vpop.f32.mrb[67].mxu0  ;;  %v3140_v35 = vpop.f32.mrb[67].mxu1 }
0x14ee   :  { %v2721_v36 = vmul.f32 -1.442695, %v1995_v32 }
0x14f0   :  { %3339 = vpow2.f32 %v2721_v36 }
0x14f1   :  { %v2102_v39 = vpop.f32.mrb[68].mxu0  ;;  %v2168_v40 = vpop.f32.mrb[68].mxu1 }
0x14f2   :  { %v2103_v41 = vadd.f32 %v2102_v39, %v2056_v34  ;;  %v2174_v47 = vadd.f32 %v2168_v40, %v161_v57  ;;  %v3147_v21 = vpop.f32.mrb[69].mxu0  ;;  %v3155_v43 = vpop.f32.mrb[69].mxu1 }
0x14f3   :  { %v2105_v44 = vpop.f32.mrb[70].mxu0  ;;  %v2171_v50 = vpop.f32.mrb[70].mxu1 }
0x14f4   :  { %v2108_v48 = vadd.f32 %v3869_v24, %v2103_v41  ;;  %v2728_v49 = vmul.f32 -1.442695, %v2174_v47  ;;  %v3148_v52 = vpop.f32.mrb[71].mxu0  ;;  %v3156_v53 = vpop.f32.mrb[71].mxu1 }
0x14f6   :  { %v2725_v12 = vmul.f32 -1.442695, %v2108_v48  ;;  %3341 = vpow2.f32 %v2728_v49 }
0x14f8   :  { %3343 = vpow2.f32 %v2725_v12 }
0x14fa   :  { %v3340_v1 = vpop.eup %3339 }
0x14fb   :  { %v1999_v59 = vadd.f32 1.0, %v3340_v1 }
0x14fd   :  { %3345 = vrcp.f32 %v1999_v59 }
0x1500   :  { %v3342_v63 = vpop.eup %3341 }
0x1501   :  { %v2178_v33 = vadd.f32 1.0, %v3342_v63 }
0x1502   :  { %v3344_v60 = vpop.eup %3343 }
0x1503   :  { %v2112_v18 = vadd.f32 1.0, %v3344_v60  ;;  %3347 = vrcp.f32 %v2178_v33 }
0x1505   :  { %3349 = vrcp.f32 %v2112_v18 }
0x1507   :  { %v3346_v62 = vpop.eup %3345 }
0x1508   :  { %v2002_v2 = vmul.f32 2.0, %v3346_v62  ;;  %v2004_v8 = vmul.f32 %v3346_v62, %v3879_v58 }
0x150a   :  { %v2722_v9 = vadd.f32 -1.0, %v2002_v2 }
0x150c   :  { %2006 = vrot.lane.b32.xlu0 %v2722_v9, %s3412_s30 }
0x150d   :  { %v3348_v28 = vpop.eup %3347 }
0x150e   :  { %v2181_v5 = vmul.f32 2.0, %v3348_v28  ;;  %v2183_v26 = vmul.f32 %v3348_v28, %v3883_v16 }
0x150f   :  { %v3350_v6 = vpop.eup %3349 }
0x1510   :  { %v2729_v22 = vadd.f32 -1.0, %v2181_v5  ;;  %v2115_v7 = vmul.f32 2.0, %v3350_v6  ;;  %v2117_v27 = vmul.f32 %v3350_v6, %v3887_v23 }
0x1512   :  { %2185 = vrot.lane.b32.xlu0 %v2729_v22, %s3412_s30  ;;  %v2726_v10 = vadd.f32 -1.0, %v2115_v7 }
0x1514   :  { %2119 = vrot.lane.b32.xlu1 %v2726_v10, %s3412_s30 }
0x157e   :  { %v2007_v11 = vpop.permute.xlu0 %2006 }
0x157f   :  { %v2009_v13 = vmul.f32 %v3346_v62, %v2007_v11 }
0x1581   :  { %2011 = vrot.lane.b32.xlu1 %v2009_v13, %s3413_s3 }
0x1584   :  { %v2186_v14 = vpop.permute.xlu0 %2185 }
0x1585   :  { %v2188_v19 = vmul.f32 %v3348_v28, %v2186_v14 }
0x1586   :  { %v2120_v20 = vpop.permute.xlu1 %2119 }
0x1587   :  { %v2122_v31 = vmul.f32 %v3350_v6, %v2120_v20  ;;  %2190 = vrot.lane.b32.xlu1 %v2188_v19, %s3413_s3 }
0x1589   :  { %2124 = vrot.lane.b32.xlu0 %v2122_v31, %s3413_s3 }
0x15f3   :  { %v2012_v15 = vpop.permute.xlu1 %2011 }
0x15f4   :  { %v3944_v25 = vadd.f32 %v2012_v15, %v2004_v8 }
0x15f6   :  { %3351 = vtanh.f32 %v3944_v25 }
0x15f9   :  { %v2191_v17 = vpop.permute.xlu1 %2190 }
0x15fa   :  { %v2193_v34 = vadd.f32 %v2191_v17, %v2183_v26 }
0x15fb   :  { %v2125_v61 = vpop.permute.xlu0 %2124 }
0x15fc   :  { %3353 = vtanh.f32 %v2193_v34  ;;  %v3949_v37 = vadd.f32 %v2125_v61, %v2117_v27 }
0x15fe   :  { %3355 = vtanh.f32 %v3949_v37 }
0x1600   :  { %v3352_v29 = vpop.eup %3351 }
0x1601   :  { %2017 = vrot.lane.b32.xlu0 %v3352_v29, %s3412_s30 }
0x1606   :  { %v3354_v58 = vpop.eup %3353 }
0x1607   :  { %2196 = vrot.lane.b32.xlu0 %v3354_v58, %s3412_s30 }
0x1608   :  { %v3356_v45 = vpop.eup %3355 }
0x1609   :  { %2130 = vrot.lane.b32.xlu1 %v3356_v45, %s3412_s30 }
0x1673   :  { %v2018_v16 = vpop.permute.xlu0 %2017 }
0x1674   :  { %v2020_v32 = vmul.f32 %v3346_v62, %v2018_v16 }
0x1676   :  { %v2201_v51 = vpack.c.bf16 %v2020_v32, %v2020_v32 }
0x1678   :  { %2203 = vrot.lane.b32.xlu1 %v2201_v51, %s3413_s3 }
0x1679   :  { %v2197_v23 = vpop.permute.xlu0 %2196 }
0x167a   :  { %v2199_v35 = vmul.f32 %v3348_v28, %v2197_v23 }
0x167b   :  { %v2131_v36 = vpop.permute.xlu1 %2130 }
0x167c   :  { %v2320_v57 = vpack.c.bf16 %v2199_v35, %v2199_v35  ;;  %v2133_v39 = vmul.f32 %v3350_v6, %v2131_v36 }
0x167e   :  { %v2200_v40 = vpack.c.bf16 %v2133_v39, %v2133_v39  ;;  %2362 = vrot.lane.b32.xlu1 %v2320_v57, %s3413_s3 }
0x1680   :  { %2249 = vrot.lane.b32.xlu0 %v2200_v40, %s3413_s3 }
0x16ea   :  { %v2204_v41 = vpop.permute.xlu1 %2203 }
0x16eb   :  { %3162 = vmatmul.mubr.msk.bf16.vlgmr.msra.gmra.mrb[72].mxu0 %vm164_vm2, %v2204_v41 }
0x16ec   :  { %3174 = vmatpush3.bf16.msra.mxu0 %v3493_v46  ;;  %3177 = vmatprep.mubr.msk.bf16.mxu0 %vm3410_vm0, %v3409_v0 }
0x16ed   :  { %3175 = vmatprep.subr.bf16.mxu0 %v3409_v0 }
0x16f0   :  { %3176 = vmatpush3.bf16.msra.mxu0 %v3504_v55  ;;  %v2363_v46 = vpop.permute.xlu1 %2362 }
0x16f1   :  { %3189 = vmatprep.subr.bf16.mxu0 %v3409_v0 }
0x16f2   :  { %v2250_v47 = vpop.permute.xlu0 %2249 }
0x16f3   :  { %3170 = vmatmul.mubr.msk.bf16.vlgmr.msra.gmra.mrb[72].mxu1 %vm164_vm2, %v2250_v47  ;;  %3178 = vmatmul.mubr.msk.bf16.vlgmr.msra.gmra.mrb[76].mxu0 %vm164_vm2, %v2250_v47 }
0x16f4   :  { %3182 = vmatpush3.bf16.msra.mxu1 %v3485_v42  ;;  %3185 = vmatprep.mubr.msk.bf16.mxu1 %vm3410_vm0, %v3409_v0 }
0x16f5   :  { %3183 = vmatprep.subr.bf16.mxu1 %v3409_v0  ;;  %3190 = vmatpush3.bf16.msra.mxu0 %v3556_v54 }
0x16f6   :  { %3191 = vmatprep.subr.bf16.mxu0 %v3409_v0  ;;  %3193 = vmatprep.mubr.msk.bf16.mxu0 %vm3410_vm0, %v3409_v0 }
0x16f8   :  { %3184 = vmatpush3.bf16.msra.mxu1 %v3506_v56 }
0x16f9   :  { %3192 = vmatpush3.bf16.msra.mxu0 %v3561_v3  ;;  %3197 = vmatprep.subr.bf16.mxu1 %v3409_v0 }
0x16fb   :  { %3186 = vmatmul.mubr.msk.bf16.vlgmr.msra.gmra.mrb[76].mxu1 %vm164_vm2, %v2363_v46 }
0x16fc   :  { %3198 = vmatpush3.bf16.msra.mxu1 %v3558_v38  ;;  %3201 = vmatprep.mubr.msk.bf16.mxu1 %vm3410_vm0, %v3409_v0 }
0x16fd   :  { %3199 = vmatprep.subr.bf16.mxu1 %v3409_v0 }
0x1700   :  { %3200 = vmatpush3.bf16.msra.mxu1 %v3565_v4 }
0x17be   :  { %v2242_v42 = vpop.f32.mrb[72].mxu0 }
0x17bf   :  { %v3163_v55 = vpop.f32.mrb[73].mxu0 }
0x17c0   :  { %v2245_v54 = vpop.f32.mrb[74].mxu0 }
0x17c1   :  { %v3164_v56 = vpop.f32.mrb[75].mxu0 }
0x17c6   :  { %v2288_v21 = vpop.f32.mrb[72].mxu1  ;;  %v2355_v3 = vpop.f32.mrb[76].mxu0 }
0x17c7   :  { %v2289_v43 = vadd.f32 %v2288_v21, %v2242_v42  ;;  %v3171_v44 = vpop.f32.mrb[73].mxu1  ;;  %v3179_v50 = vpop.f32.mrb[77].mxu0 }
0x17c8   :  { %v2291_v48 = vpop.f32.mrb[74].mxu1  ;;  %v2358_v49 = vpop.f32.mrb[78].mxu0 }
0x17c9   :  { %v2294_v38 = vadd.f32 %v3931_v30, %v2289_v43  ;;  %v3172_v52 = vpop.f32.mrb[75].mxu1  ;;  %v3180_v53 = vpop.f32.mrb[79].mxu0  ;;  %v2554_v49 = vld [vmem:[#allocation2 + $0xd0] sm:$0xff] }
0x17ca   :  { %v3414_v52 = vmov 0.0|0.0  }
0x17cb   :  { %v2732_v12 = vmul.f32 -1.442695, %v2294_v38  ;;  %v2555_v38 = vld [vmem:[#allocation2 + $0xd8] sm:$0xff]  ;;  %3216 = vmatprep.subr.bf16.mxu0 %v3414_v52 }
0x17cd   :  { %3357 = vpow2.f32 %v2732_v12  ;;  %v2556_v12 = vld [vmem:[#allocation2 + $0xe0] sm:$0xff] }
0x17ce   :  { %v2401_v1 = vpop.f32.mrb[76].mxu1 }
0x17cf   :  { %v2402_v59 = vadd.f32 %v2401_v1, %v2355_v3  ;;  %v3187_v4 = vpop.f32.mrb[77].mxu1  ;;  %v3220_v1 = vpack.c.bf16 %v2556_v12, %v2555_v38 }
0x17d0   :  { %v2404_v63 = vpop.f32.mrb[78].mxu1 }
0x17d1   :  { %v2407_v33 = vadd.f32 %v3869_v24, %v2402_v59  ;;  %v3188_v60 = vpop.f32.mrb[79].mxu1 }
0x17d2   :  { %v2742_v60 = vld [vmem:[#allocation2 + $0xe8] ss:$0 sm:$0xff] }
0x17d3   :  { %v2736_v18 = vmul.f32 -1.442695, %v2407_v33 }
0x17d5   :  { %3359 = vpow2.f32 %v2736_v18 }
0x17d7   :  { %v3358_v62 = vpop.eup %3357 }
0x17d8   :  { %v2298_v2 = vadd.f32 1.0, %v3358_v62 }
0x17da   :  { %3361 = vrcp.f32 %v2298_v2 }
0x17df   :  { %v3360_v9 = vpop.eup %3359 }
0x17e0   :  { %v2411_v28 = vadd.f32 1.0, %v3360_v9 }
0x17e2   :  { %3363 = vrcp.f32 %v2411_v28 }
0x17e4   :  { %v3362_v5 = vpop.eup %3361 }
0x17e5   :  { %v2301_v6 = vmul.f32 2.0, %v3362_v5  ;;  %v2303_v20 = vmul.f32 %v3362_v5, %v3944_v25 }
0x17e7   :  { %v2733_v22 = vadd.f32 -1.0, %v2301_v6 }
0x17e9   :  { %2305 = vrot.lane.b32.xlu0 %v2733_v22, %s3412_s30 }
0x17ec   :  { %v3364_v7 = vpop.eup %3363 }
0x17ed   :  { %v2414_v10 = vmul.f32 2.0, %v3364_v7  ;;  %v2416_v15 = vmul.f32 %v3364_v7, %v3949_v37 }
0x17ef   :  { %v2737_v11 = vadd.f32 -1.0, %v2414_v10 }
0x17f1   :  { %2418 = vrot.lane.b32.xlu1 %v2737_v11, %s3412_s30 }
0x185b   :  { %v2306_v24 = vpop.permute.xlu0 %2305 }
0x185c   :  { %v2308_v13 = vmul.f32 %v3362_v5, %v2306_v24 }
0x185e   :  { %2310 = vrot.lane.b32.xlu0 %v2308_v13, %s3413_s3 }
0x1863   :  { %v2419_v14 = vpop.permute.xlu1 %2418 }
0x1864   :  { %v2421_v19 = vmul.f32 %v3364_v7, %v2419_v14 }
0x1866   :  { %2423 = vrot.lane.b32.xlu1 %v2421_v19, %s3413_s3 }
0x18d0   :  { %v2311_v31 = vpop.permute.xlu0 %2310 }
0x18d1   :  { %v2313_v8 = vadd.f32 %v2311_v31, %v2303_v20 }
0x18d3   :  { %3365 = vtanh.f32 %v2313_v8 }
0x18d8   :  { %v2424_v26 = vpop.permute.xlu1 %2423 }
0x18d9   :  { %v2426_v17 = vadd.f32 %v2424_v26, %v2416_v15 }
0x18db   :  { %3367 = vtanh.f32 %v2426_v17 }
0x18dd   :  { %v3366_v34 = vpop.eup %3365 }
0x18de   :  { %2316 = vrot.lane.b32.xlu0 %v3366_v34, %s3412_s30 }
0x18e5   :  { %v3368_v27 = vpop.eup %3367 }
0x18e6   :  { %2429 = vrot.lane.b32.xlu1 %v3368_v27, %s3412_s30 }
0x1950   :  { %v2317_v61 = vpop.permute.xlu0 %2316 }
0x1951   :  { %v2319_v29 = vmul.f32 %v3362_v5, %v2317_v61 }
0x1953   :  { %v2434_v58 = vpack.c.bf16 %v2319_v29, %v2319_v29 }
0x1955   :  { %2436 = vrot.lane.b32.xlu0 %v2434_v58, %s3413_s3 }
0x1958   :  { %v2430_v25 = vpop.permute.xlu1 %2429 }
0x1959   :  { %v2432_v45 = vmul.f32 %v3364_v7, %v2430_v25 }
0x195b   :  { %v2433_v16 = vpack.c.bf16 %v2432_v45, %v2432_v45 }
0x195d   :  { %2482 = vrot.lane.b32.xlu1 %v2433_v16, %s3413_s3 }
0x19c7   :  { %v2437_v37 = vpop.permute.xlu0 %2436 }
0x19c8   :  { %3194 = vmatmul.mubr.msk.bf16.vlgmr.msra.gmra.mrb[80].mxu0 %vm164_vm2, %v2437_v37 }
0x19c9   :  { %3213 = vmatprep.mubr.msk.f32.mxu0 %vm3410_vm0, %v3409_v0 }
0x19cf   :  { %v2483_v32 = vpop.permute.xlu1 %2482 }
0x19d0   :  { %3202 = vmatmul.mubr.msk.bf16.vlgmr.msra.gmra.mrb[80].mxu1 %vm164_vm2, %v2483_v32 }
0x1a9b   :  { %v2475_v51 = vpop.f32.mrb[80].mxu0 }
0x1a9c   :  { %v3195_v23 = vpop.f32.mrb[81].mxu0 }
0x1a9d   :  { %v2478_v35 = vpop.f32.mrb[82].mxu0 }
0x1a9e   :  { %v3196_v36 = vpop.f32.mrb[83].mxu0 }
0x1aa3   :  { %v2521_v57 = vpop.f32.mrb[80].mxu1 }
0x1aa4   :  { %v2522_v39 = vadd.f32 %v2521_v57, %v2475_v51  ;;  %v3203_v40 = vpop.f32.mrb[81].mxu1 }
0x1aa5   :  { %v2524_v41 = vpop.f32.mrb[82].mxu1 }
0x1aa6   :  { %v2527_v47 = vadd.f32 %v3931_v30, %v2522_v39  ;;  %v3204_v46 = vpop.f32.mrb[83].mxu1  ;;  %v2553_v30 = vld [vmem:[#allocation2 + $0xc8] sm:$0xff] }
0x1aa7   :  { %v3217_v53 = vpack.c.bf16 %v2554_v49, %v2553_v30 }
0x1aa8   :  { %v2740_v42 = vmul.f32 -1.442695, %v2527_v47 }
0x1aa9   :  { %3218 = vmatpush3.bf16.msra.mxu0 %v3217_v53 }
0x1aaa   :  { %3369 = vpow2.f32 %v2740_v42  ;;  %3219 = vmatprep.subr.bf16.mxu0 %v3414_v52 }
0x1aad   :  { %3221 = vmatpush3.bf16.msra.mxu0 %v3220_v1 }
0x1ab4   :  { %v3370_v55 = vpop.eup %3369 }
0x1ab5   :  { %v2531_v54 = vadd.f32 1.0, %v3370_v55 }
0x1ab7   :  { %3371 = vrcp.f32 %v2531_v54 }
0x1ac1   :  { %v3372_v0 = vpop.eup %3371 }
0x1ac2   :  { %v2534_v56 = vmul.f32 2.0, %v3372_v0  ;;  %v2536_v44 = vmul.f32 %v3372_v0, %v2313_v8 }
0x1ac4   :  { %v2741_v21 = vadd.f32 -1.0, %v2534_v56 }
0x1ac6   :  { %2538 = vrot.lane.b32.xlu0 %v2741_v21, %s3412_s30 }
0x1b38   :  { %v2539_v3 = vpop.permute.xlu0 %2538 }
0x1b39   :  { %v2541_v43 = vmul.f32 %v3372_v0, %v2539_v3 }
0x1b3b   :  { %2543 = vrot.lane.b32.xlu1 %v2541_v43, %s3413_s3 }
0x1bad   :  { %v2544_v50 = vpop.permute.xlu1 %2543 }
0x1bae   :  { %v2546_v48 = vadd.f32 %v2544_v50, %v2536_v44 }
0x1bb0   :  { %3373 = vtanh.f32 %v2546_v48 }
0x1bba   :  { %v3374_v59 = vpop.eup %3373 }
0x1bbb   :  { %2549 = vrot.lane.b32.xlu0 %v3374_v59, %s3412_s30 }
0x1c2d   :  { %v2550_v4 = vpop.permute.xlu0 %2549 }
0x1c2e   :  { %v2552_v63 = vmul.f32 %v3372_v0, %v2550_v4 }
0x1c30   :  { %2563 = vrot.lane.b32.xlu1 %v2552_v63, %s3413_s3 }
0x1ca2   :  { %v2564_v33 = vpop.permute.xlu1 %2563 }
0x1ca3   :  { %3214 = vmatmul.mubr.msk.f32.vlgmr.msra.gmra.mrb[84].mxu0 %vm164_vm2, %v2564_v33 }
0x1d76   :  { %v2633_v18 = vpop.f32.mrb[84].mxu0 }
0x1d77   :  { %v2634_v62 = vadd.f32 %v2742_v60, %v2633_v18  ;;  %v3215_v2 = vpop.f32.mrb[85].mxu0 }
0x1d79   :  { %v2744_v9 = vmul.f32 -1.442695, %v2634_v62 }
0x1d7b   :  { %3375 = vpow2.f32 %v2744_v9 }
0x1d85   :  { %v3376_v28 = vpop.eup %3375 }
0x1d86   :  { %v2640_v5 = vadd.f32 1.0, %v3376_v28 }
0x1d88   :  { %3377 = vrcp.f32 %v2640_v5 }
0x1d92   :  { %v3378_v6 = vpop.eup %3377 }
0x1d93   :  { %2644 = vst.msk [vmem:[%s4011_s2] sm:$0xff] %vm2643_vm3, %v3378_v6 }
0x1d94   :  { %2649 = vsyncpa [#allocation3], 1 }

</bundles_post_ra>
